<compile_context>
chip_gen: v7x
topology: tpu7x:2x2x1
jax: 0.10.0
libtpu: 0.0.40
codegen_flags: <defaults>
</compile_context>

<pallas_src>
import jax
import jax.numpy as jnp
from jax.experimental import pallas as pl
from jax.experimental.pallas import tpu as pltpu


def _nerf_mlp_kernel(x_ref, w1_ref, b1_ref, w2_ref, b2_ref, w3_ref, b3_ref,
                     wo_ref, bo_ref, out_ref):
    # In-kernel bf16 cast of the activation tile (VPU work, hidden under the
    # MXU); every GEMM is a single-pass bf16 MXU op with an f32 accumulator.
    x = x_ref[...].astype(jnp.bfloat16)

    h = jnp.dot(x, w1_ref[...], preferred_element_type=jnp.float32) + b1_ref[...]
    h = jnp.maximum(h, 0.0).astype(jnp.bfloat16)

    h = jnp.dot(h, w2_ref[...], preferred_element_type=jnp.float32) + b2_ref[...]
    h = jnp.maximum(h, 0.0).astype(jnp.bfloat16)

    h = jnp.dot(h, w3_ref[...], preferred_element_type=jnp.float32) + b3_ref[...]
    h = jnp.maximum(h, 0.0).astype(jnp.bfloat16)

    o = jnp.dot(h, wo_ref[...], preferred_element_type=jnp.float32) + bo_ref[...]

    out_ref[...] = (1.0 / (1.0 + jnp.exp(-o))).astype(out_ref.dtype)


def _pick_block_b(b_sz, max_block_b):
    """Largest multiple-of-256 tile <= max_block_b that still gives >= 2 grid
    steps when B > 256 (keeps both v7x TensorCores busy)."""
    half = -(-b_sz // 2)                 # ceil(B / 2)
    blk = -(-half // 256) * 256          # round up to a multiple of 256
    return max(256, min(max_block_b, blk))


def nerf_forward(x, params, *, max_block_b=2048):
    """Pallas equivalent of NeRF.forward.  x: (B, in_channels) f32 -> (B, 3) f32."""
    w1, b1 = params["w1"], params["b1"]
    w2, b2 = params["w2"], params["b2"]
    w3, b3 = params["w3"], params["b3"]
    wo, bo = params["wo"], params["bo"]

    b_sz, c = x.shape
    width = w1.shape[1]
    n_out = wo.shape[1]

    # Weights in bf16 (single-pass MXU).  Biases stay f32 and add into the
    # f32 accumulator; reshaped to (1, N) so they live in lane-dense tiles and
    # broadcast over the sublane (batch) axis inside the kernel.
    w1_bf = w1.astype(jnp.bfloat16)
    w2_bf = w2.astype(jnp.bfloat16)
    w3_bf = w3.astype(jnp.bfloat16)
    wo_bf = wo.astype(jnp.bfloat16)
    b1_2d = b1.reshape(1, width).astype(jnp.float32)
    b2_2d = b2.reshape(1, width).astype(jnp.float32)
    b3_2d = b3.reshape(1, width).astype(jnp.float32)
    bo_2d = bo.reshape(1, n_out).astype(jnp.float32)

    block_b = _pick_block_b(b_sz, max_block_b)
    grid = (pl.cdiv(b_sz, block_b),)   # partial last block: OOB rows masked on store

    const = lambda i: (0, 0)  # weights/biases resident across all grid steps

    flops = 2 * b_sz * (c * width + 2 * width * width + width * n_out)
    weight_bytes = (2 * (c * width + 2 * width * width + width * n_out)
                    + 4 * (3 * width + n_out))
    cost = pl.CostEstimate(
        flops=flops,
        transcendentals=b_sz * n_out,                      # sigmoid exp
        bytes_accessed=b_sz * 4 * (c + n_out) + weight_bytes)

    return pl.pallas_call(
        _nerf_mlp_kernel,
        out_shape=jax.ShapeDtypeStruct((b_sz, n_out), jnp.float32),
        grid=grid,
        in_specs=[
            pl.BlockSpec((block_b, c), lambda i: (i, 0)),   # x tile
            pl.BlockSpec((c, width), const),                # W1 (bf16)
            pl.BlockSpec((1, width), const),                # b1
            pl.BlockSpec((width, width), const),            # W2 (bf16)
            pl.BlockSpec((1, width), const),                # b2
            pl.BlockSpec((width, width), const),            # W3 (bf16)
            pl.BlockSpec((1, width), const),                # b3
            pl.BlockSpec((width, n_out), const),            # Wo (bf16)
            pl.BlockSpec((1, n_out), const),                # bo
        ],
        out_specs=pl.BlockSpec((block_b, n_out), lambda i: (i, 0)),
        compiler_params=pltpu.CompilerParams(
            dimension_semantics=("parallel",),
            vmem_limit_bytes=48 * 1024 * 1024),
        cost_estimate=cost,
    )(x, w1_bf, b1_2d, w2_bf, b2_2d, w3_bf, b3_2d, wo_bf, bo_2d)


def _reference_bf16(x, params):
    """Pure-JAX reference mirroring the kernel's bf16-in / f32-accumulate math."""
    def dense(h, w, b):
        return jnp.dot(h.astype(jnp.bfloat16), w.astype(jnp.bfloat16),
                       preferred_element_type=jnp.float32) + b
    h = jnp.maximum(dense(x, params["w1"], params["b1"]), 0.0)
    h = jnp.maximum(dense(h, params["w2"], params["b2"]), 0.0)
    h = jnp.maximum(dense(h, params["w3"], params["b3"]), 0.0)
    o = dense(h, params["wo"], params["bo"])
    return 1.0 / (1.0 + jnp.exp(-o))


def _init_params(key, in_channels, width=256, n_out=3):
    ks = jax.random.split(key, 8)
    def lin(kw, kb, fan_in, fan_out):
        s = 1.0 / jnp.sqrt(fan_in)
        w = jax.random.uniform(kw, (fan_in, fan_out), jnp.float32, -s, s)
        b = jax.random.uniform(kb, (fan_out,), jnp.float32, -s, s)
        return w, b
    w1, b1 = lin(ks[0], ks[1], in_channels, width)
    w2, b2 = lin(ks[2], ks[3], width, width)
    w3, b3 = lin(ks[4], ks[5], width, width)
    wo, bo = lin(ks[6], ks[7], width, n_out)
    return dict(w1=w1, b1=b1, w2=w2, b2=b2, w3=w3, b3=b3, wo=wo, bo=bo)


if __name__ == "__main__":
    key = jax.random.PRNGKey(0)
    k_x, k_p = jax.random.split(key)

    # B=500 exercises the no-pad partial last block and a 2-step grid.
    B, IN_CHANNELS, WIDTH = 500, 63, 256
    x = jax.random.normal(k_x, (B, IN_CHANNELS), dtype=jnp.float32)
    params = _init_params(k_p, IN_CHANNELS, WIDTH)

    out = jax.block_until_ready(nerf_forward(x, params))
    ref = jax.block_until_ready(_reference_bf16(x, params))

    assert out.shape == (B, 3), out.shape
    max_err = float(jnp.max(jnp.abs(out - ref)))
    assert max_err < 1e-3, max_err

    print("KERNEL_OK")
</pallas_src>

<mosaic_0001>
module attributes {stable_mosaic.version = 11 : i64} {
  func.func @_nerf_mlp_kernel(%arg0: i32, %arg1: memref<256x63xf32, #tpu.memory_space<vmem>>, %arg2: memref<63x256xbf16, #tpu.memory_space<vmem>>, %arg3: memref<1x256xf32, #tpu.memory_space<vmem>>, %arg4: memref<256x256xbf16, #tpu.memory_space<vmem>>, %arg5: memref<1x256xf32, #tpu.memory_space<vmem>>, %arg6: memref<256x256xbf16, #tpu.memory_space<vmem>>, %arg7: memref<1x256xf32, #tpu.memory_space<vmem>>, %arg8: memref<256x3xbf16, #tpu.memory_space<vmem>>, %arg9: memref<1x3xf32, #tpu.memory_space<vmem>>, %arg10: memref<256x3xf32, #tpu.memory_space<vmem>>) attributes {dimension_semantics = [#tpu.dimension_semantics<parallel>], iteration_bounds = array<i64: 2>, scalar_prefetch = 0 : i64, scratch_operands = 0 : i64, tpu.core_type = #tpu.core_type<tc>, window_params = [{transform_indices = @transform_0, window_bounds = array<i64: 256, 63>}, {pipeline_mode = #tpu.pipeline_mode<synchronous>, transform_indices = @transform_1, window_bounds = array<i64: 63, 256>}, {pipeline_mode = #tpu.pipeline_mode<synchronous>, transform_indices = @transform_2, window_bounds = array<i64: 1, 256>}, {pipeline_mode = #tpu.pipeline_mode<synchronous>, transform_indices = @transform_3, window_bounds = array<i64: 256, 256>}, {pipeline_mode = #tpu.pipeline_mode<synchronous>, transform_indices = @transform_4, window_bounds = array<i64: 1, 256>}, {pipeline_mode = #tpu.pipeline_mode<synchronous>, transform_indices = @transform_5, window_bounds = array<i64: 256, 256>}, {pipeline_mode = #tpu.pipeline_mode<synchronous>, transform_indices = @transform_6, window_bounds = array<i64: 1, 256>}, {pipeline_mode = #tpu.pipeline_mode<synchronous>, transform_indices = @transform_7, window_bounds = array<i64: 256, 3>}, {pipeline_mode = #tpu.pipeline_mode<synchronous>, transform_indices = @transform_8, window_bounds = array<i64: 1, 3>}, {transform_indices = @transform_9, window_bounds = array<i64: 256, 3>}]} {
    %c0 = arith.constant 0 : index
    %c0_0 = arith.constant 0 : index
    %0 = vector.load %arg1[%c0, %c0_0] : memref<256x63xf32, #tpu.memory_space<vmem>>, vector<256x63xf32>
    %1 = arith.truncf %0 : vector<256x63xf32> to vector<256x63xbf16>
    %c0_1 = arith.constant 0 : index
    %c0_2 = arith.constant 0 : index
    %2 = vector.load %arg2[%c0_1, %c0_2] : memref<63x256xbf16, #tpu.memory_space<vmem>>, vector<63x256xbf16>
    %cst = arith.constant dense<0.000000e+00> : vector<256x256xf32>
    %3 = tpu.matmul %1, %2, %cst {dimension_numbers = #tpu.dot_dimension_numbers<[1], [0], [0], [1], [0, 0, 1, 1], [], []>} : vector<256x63xbf16>, vector<63x256xbf16>, vector<256x256xf32> -> vector<256x256xf32>
    %c0_3 = arith.constant 0 : index
    %c0_4 = arith.constant 0 : index
    %4 = vector.load %arg3[%c0_3, %c0_4] : memref<1x256xf32, #tpu.memory_space<vmem>>, vector<1x256xf32>
    %5 = vector.broadcast %4 : vector<1x256xf32> to vector<256x256xf32>
    %6 = arith.addf %3, %5 : vector<256x256xf32>
    %cst_5 = arith.constant 0.000000e+00 : f32
    %7 = vector.broadcast %cst_5 : f32 to vector<256x256xf32>
    %8 = arith.maximumf %6, %7 : vector<256x256xf32>
    %9 = arith.truncf %8 : vector<256x256xf32> to vector<256x256xbf16>
    %c0_6 = arith.constant 0 : index
    %c0_7 = arith.constant 0 : index
    %10 = vector.load %arg4[%c0_6, %c0_7] : memref<256x256xbf16, #tpu.memory_space<vmem>>, vector<256x256xbf16>
    %cst_8 = arith.constant dense<0.000000e+00> : vector<256x256xf32>
    %11 = tpu.matmul %9, %10, %cst_8 {dimension_numbers = #tpu.dot_dimension_numbers<[1], [0], [0], [1], [0, 0, 1, 1], [], []>} : vector<256x256xbf16>, vector<256x256xbf16>, vector<256x256xf32> -> vector<256x256xf32>
    %c0_9 = arith.constant 0 : index
    %c0_10 = arith.constant 0 : index
    %12 = vector.load %arg5[%c0_9, %c0_10] : memref<1x256xf32, #tpu.memory_space<vmem>>, vector<1x256xf32>
    %13 = vector.broadcast %12 : vector<1x256xf32> to vector<256x256xf32>
    %14 = arith.addf %11, %13 : vector<256x256xf32>
    %cst_11 = arith.constant 0.000000e+00 : f32
    %15 = vector.broadcast %cst_11 : f32 to vector<256x256xf32>
    %16 = arith.maximumf %14, %15 : vector<256x256xf32>
    %17 = arith.truncf %16 : vector<256x256xf32> to vector<256x256xbf16>
    %c0_12 = arith.constant 0 : index
    %c0_13 = arith.constant 0 : index
    %18 = vector.load %arg6[%c0_12, %c0_13] : memref<256x256xbf16, #tpu.memory_space<vmem>>, vector<256x256xbf16>
    %cst_14 = arith.constant dense<0.000000e+00> : vector<256x256xf32>
    %19 = tpu.matmul %17, %18, %cst_14 {dimension_numbers = #tpu.dot_dimension_numbers<[1], [0], [0], [1], [0, 0, 1, 1], [], []>} : vector<256x256xbf16>, vector<256x256xbf16>, vector<256x256xf32> -> vector<256x256xf32>
    %c0_15 = arith.constant 0 : index
    %c0_16 = arith.constant 0 : index
    %20 = vector.load %arg7[%c0_15, %c0_16] : memref<1x256xf32, #tpu.memory_space<vmem>>, vector<1x256xf32>
    %21 = vector.broadcast %20 : vector<1x256xf32> to vector<256x256xf32>
    %22 = arith.addf %19, %21 : vector<256x256xf32>
    %cst_17 = arith.constant 0.000000e+00 : f32
    %23 = vector.broadcast %cst_17 : f32 to vector<256x256xf32>
    %24 = arith.maximumf %22, %23 : vector<256x256xf32>
    %25 = arith.truncf %24 : vector<256x256xf32> to vector<256x256xbf16>
    %c0_18 = arith.constant 0 : index
    %c0_19 = arith.constant 0 : index
    %26 = vector.load %arg8[%c0_18, %c0_19] : memref<256x3xbf16, #tpu.memory_space<vmem>>, vector<256x3xbf16>
    %cst_20 = arith.constant dense<0.000000e+00> : vector<256x3xf32>
    %27 = tpu.matmul %25, %26, %cst_20 {dimension_numbers = #tpu.dot_dimension_numbers<[1], [0], [0], [1], [0, 0, 1, 1], [], []>} : vector<256x256xbf16>, vector<256x3xbf16>, vector<256x3xf32> -> vector<256x3xf32>
    %c0_21 = arith.constant 0 : index
    %c0_22 = arith.constant 0 : index
    %28 = vector.load %arg9[%c0_21, %c0_22] : memref<1x3xf32, #tpu.memory_space<vmem>>, vector<1x3xf32>
    %29 = vector.broadcast %28 : vector<1x3xf32> to vector<256x3xf32>
    %30 = arith.addf %27, %29 : vector<256x3xf32>
    %cst_23 = arith.constant 0.000000e+00 : f32
    %31 = vector.broadcast %cst_23 : f32 to vector<256x3xf32>
    %32 = arith.subf %31, %30 : vector<256x3xf32>
    %33 = math.exp %32 : vector<256x3xf32>
    %cst_24 = arith.constant 1.000000e+00 : f32
    %34 = vector.broadcast %cst_24 : f32 to vector<256x3xf32>
    %35 = arith.addf %34, %33 : vector<256x3xf32>
    %cst_25 = arith.constant 1.000000e+00 : f32
    %36 = vector.broadcast %cst_25 : f32 to vector<256x3xf32>
    %37 = arith.divf %36, %35 : vector<256x3xf32>
    %c0_26 = arith.constant 0 : index
    %c0_27 = arith.constant 0 : index
    %38 = vector.load %arg10[%c0_26, %c0_27] : memref<256x3xf32, #tpu.memory_space<vmem>>, vector<256x3xf32>
    tpu.vector_store %arg10[%c0_26, %c0_27], %37 {strides = array<i32>} : memref<256x3xf32, #tpu.memory_space<vmem>>, vector<256x3xf32>,
    return
  }
  func.func @transform_0(%arg0: i32) -> (i32, i32) {
    %c0_i32 = arith.constant 0 : i32
    %c0_i32_0 = arith.constant 0 : i32
    return %arg0, %c0_i32 : i32, i32
  }
  func.func @transform_1(%arg0: i32) -> (i32, i32) {
    %c0_i32 = arith.constant 0 : i32
    %c0_i32_0 = arith.constant 0 : i32
    %c0_i32_1 = arith.constant 0 : i32
    return %c0_i32, %c0_i32_0 : i32, i32
  }
  func.func @transform_2(%arg0: i32) -> (i32, i32) {
    %c0_i32 = arith.constant 0 : i32
    %c0_i32_0 = arith.constant 0 : i32
    %c0_i32_1 = arith.constant 0 : i32
    return %c0_i32, %c0_i32_0 : i32, i32
  }
  func.func @transform_3(%arg0: i32) -> (i32, i32) {
    %c0_i32 = arith.constant 0 : i32
    %c0_i32_0 = arith.constant 0 : i32
    %c0_i32_1 = arith.constant 0 : i32
    return %c0_i32, %c0_i32_0 : i32, i32
  }
  func.func @transform_4(%arg0: i32) -> (i32, i32) {
    %c0_i32 = arith.constant 0 : i32
    %c0_i32_0 = arith.constant 0 : i32
    %c0_i32_1 = arith.constant 0 : i32
    return %c0_i32, %c0_i32_0 : i32, i32
  }
  func.func @transform_5(%arg0: i32) -> (i32, i32) {
    %c0_i32 = arith.constant 0 : i32
    %c0_i32_0 = arith.constant 0 : i32
    %c0_i32_1 = arith.constant 0 : i32
    return %c0_i32, %c0_i32_0 : i32, i32
  }
  func.func @transform_6(%arg0: i32) -> (i32, i32) {
    %c0_i32 = arith.constant 0 : i32
    %c0_i32_0 = arith.constant 0 : i32
    %c0_i32_1 = arith.constant 0 : i32
    return %c0_i32, %c0_i32_0 : i32, i32
  }
  func.func @transform_7(%arg0: i32) -> (i32, i32) {
    %c0_i32 = arith.constant 0 : i32
    %c0_i32_0 = arith.constant 0 : i32
    %c0_i32_1 = arith.constant 0 : i32
    return %c0_i32, %c0_i32_0 : i32, i32
  }
  func.func @transform_8(%arg0: i32) -> (i32, i32) {
    %c0_i32 = arith.constant 0 : i32
    %c0_i32_0 = arith.constant 0 : i32
    %c0_i32_1 = arith.constant 0 : i32
    return %c0_i32, %c0_i32_0 : i32, i32
  }
  func.func @transform_9(%arg0: i32) -> (i32, i32) {
    %c0_i32 = arith.constant 0 : i32
    %c0_i32_0 = arith.constant 0 : i32
    return %arg0, %c0_i32 : i32, i32
  }
}

</mosaic_0001>

<bundles_post_ra>
// kernel: tpu_custom_call.1
= control target key start
LH: loop header
LB: loop body
LE: loop exit
PB: predicated region body
PF: predicated region fallthrough
CT: control target
= control target key end

     0   :  { %s3397_s30 = smov 0   ;;  %s3399_s10 = smov 0   ;;  %s4230_s0 = inlined_call_operand.vmem [shape: f32[500,63], index: 0, kind: input, shape index: {}]   ;;  %s4231_s1 = inlined_call_operand.vmem [shape: bf16[63,256], index: 1, kind: input, shape index: {}]   ;;  %s4232_s2 = inlined_call_operand.vmem [shape: f32[1,256], index: 2, kind: input, shape index: {}]   ;;  %s4233_s3 = inlined_call_operand.vmem [shape: bf16[256,256], index: 3, kind: input, shape index: {}]   ;;  %s4234_s4 = inlined_call_operand.vmem [shape: f32[1,256], index: 4, kind: input, shape index: {}]   ;;  %s4235_s5 = inlined_call_operand.vmem [shape: bf16[256,256], index: 5, kind: input, shape index: {}]   ;;  %s4236_s6 = inlined_call_operand.vmem [shape: f32[1,256], index: 6, kind: input, shape index: {}]   ;;  %s4237_s7 = inlined_call_operand.vmem [shape: bf16[256,3], index: 7, kind: input, shape index: {}]   ;;  %s4238_s8 = inlined_call_operand.vmem [shape: f32[1,3], index: 8, kind: input, shape index: {}]   ;;  %s4239_s9 = inlined_call_operand.vmem [shape: f32[500,3], index: 9, kind: output, shape index: {}]  }
   0x1   :  { %s3401_s11 = smov 0  }
   0x2 LB: > { %s3410_s12 = sadd.s32 4294967295, %s3311_s11   ;;  %s3412_s13 = sadd.s32 1, %s3311_s11   ;;  %s3311_s11 = sphi %s3401_s11, %s4248_s11   ;;  %s3307_s10 = sphi %s3399_s10, %s4247_s10   ;;  %s3303_s30 = sphi %s3397_s30, %s4246_s30  }
   0x3   : > { %s217_s14 = ssub.s32 %s3311_s11, %s3412_s13  ;;  %s220_s15 = sadd.s32 1, %s3307_s10 }
   0x4   : > { %p218_p0 = scmp.eq.s32.totalorder %s217_s14, 0  ;;  %p230_p1 = scmp.ne.s32.totalorder %s3307_s10, %s3303_s30 }
   0x5   : > { %p231_p2 = scmp.eq.s32.totalorder %s3410_s12, 1  ;;  %p2658_p3 = scmp.ge.s32.totalorder %s3311_s11, 1 }
   0x6   : > { %s3420_s16 = scalar_select %p218_p0, %s3307_s10, %s220_s15  }
   0x7   : > { %p3422_p4 = por %p231_p2, %p230_p1  ;;  %p296_p5 = scmp.lt.s32.totalorder %s3311_s11, 3 }
   0x9   : > { %p297_p6 = pnand %p2658_p3, %p296_p5 }
   0xa   : > { %v3005_v0 = vld [vmem:[%s4231_s1 + $0x4] ss:$8 sps:$4 sm:$0xff] (!%p297_p6)   ;;  %vm510_vm0 = vcmask (!%p297_p6), 1046528   ;;  %v3007_v1 = vld [vmem:[%s4231_s1] ss:$8 sps:$4 sm:$0xff] (!%p297_p6)   ;;  %vm511_vm1 = vcmask (!%p297_p6), 1047552  }
   0xb   : > { %300 = sbr.rel (%p297_p6) target bundleno = 1117 (0x45d), region = 56  ;;  %520 = vmatprep.subr.bf16.mxu0 (!%p297_p6), %v3005_v0  ;;  %v3008_v2 = vld [vmem:[%s4231_s1 + $0x14] ss:$8 sps:$4 sm:$0xff] (!%p297_p6)   ;;  %v3345_v3 = vmov (!%p297_p6), 65535   ;;  %v3346_v5 = vmov (!%p297_p6), 0   ;;  %s3446_s11 = sshll.u32 (!%p297_p6), %s3410_s12, 5 }
   0xc   : > { %v512_v4 = vsel (!%p297_p6), %vm510_vm0, 4294967295, %v3345_v3  ;;  %552 = vmatprep.mubr.bf16.mxu0 (!%p297_p6), %v3346_v5  ;;  %521 = vmatpush1.bf16.msra.mxu0 (!%p297_p6), %v3007_v1  ;;  %v3010_v6 = vld [vmem:[%s4231_s1 + $0x10] ss:$8 sps:$4 sm:$0xff] (!%p297_p6)   ;;  %v3011_v7 = vld [vmem:[%s4231_s1 + $0x24] ss:$8 sps:$4 sm:$0xff] (!%p297_p6)   ;;  %p340_p7 = scmp.lt.s32.totalorder (!%p297_p6), %s3446_s11, 62 }
   0xd   : > { %522 = vmatprep.subr.bf16.mxu0 (!%p297_p6), %v3008_v2  ;;  %v3014_v8 = vld [vmem:[%s4231_s1 + $0x34] ss:$8 sps:$4 sm:$0xff] (!%p297_p6)   ;;  %v3013_v9 = vld [vmem:[%s4231_s1 + $0x20] ss:$8 sps:$4 sm:$0xff] (!%p297_p6)   ;;  %v513_v10 = vsel (!%p297_p6), %vm511_vm1, %v512_v4, 0  ;;  %vm461_vm2 = vcmask (!%p297_p6), 515072  }
   0xe   : > { %v3016_v11 = vld [vmem:[%s4231_s1 + $0x30] ss:$8 sps:$4 sm:$0xff] (!%p297_p6)   ;;  %v518_v12 = vand.u32 (!%p297_p6), %v3014_v8, %v513_v10  ;;  %v3017_v13 = vld [vmem:[%s4233_s3 + $0x4] ss:$8 sps:$4 sm:$0xff] (!%p297_p6)   ;;  %v3019_v14 = vld [vmem:[%s4233_s3] ss:$8 sps:$4 sm:$0xff] (!%p297_p6)  }
   0xf   : > { %v3020_v15 = vld [vmem:[%s4233_s3 + $0x14] ss:$8 sps:$4 sm:$0xff] (!%p297_p6)   ;;  %v515_v16 = vand.u32 (!%p297_p6), %v3016_v11, %v513_v10  ;;  %1013 = vmatprep.subr.bf16.mxu1 (!%p297_p6), %v3017_v13  ;;  %v3022_v22 = vld [vmem:[%s4233_s3 + $0x10] ss:$8 sps:$4 sm:$0xff] (!%p297_p6)   ;;  %v3023_v24 = vld [vmem:[%s4233_s3 + $0x24] ss:$8 sps:$4 sm:$0xff] (!%p297_p6)  }
  0x10   : > { %523 = vmatpush1.bf16.msra.mxu0 (!%p297_p6), %v3010_v6  ;;  %1014 = vmatpush1.bf16.msra.mxu1 (!%p297_p6), %v3019_v14  ;;  %v3025_v25 = vld [vmem:[%s4233_s3 + $0x20] ss:$8 sps:$4 sm:$0xff] (!%p297_p6)   ;;  %v3026_v26 = vld [vmem:[%s4233_s3 + $0x34] ss:$8 sps:$4 sm:$0xff] (!%p297_p6)   ;;  %v3028_v29 = vld [vmem:[%s4233_s3 + $0x30] ss:$8 sps:$4 sm:$0xff] (!%p297_p6)  }
  0x11   : > { %524 = vmatprep.subr.bf16.mxu0 (!%p297_p6), %v3011_v7  ;;  %1015 = vmatprep.subr.bf16.mxu1 (!%p297_p6), %v3020_v15  ;;  %v3029_v30 = vld [vmem:[%s4233_s3 + $0x44] ss:$8 sps:$4 sm:$0xff] (!%p297_p6)   ;;  %v3031_v32 = vld [vmem:[%s4233_s3 + $0x40] ss:$8 sps:$4 sm:$0xff] (!%p297_p6)   ;;  %v3032_v33 = vld [vmem:[%s4233_s3 + $0x54] ss:$8 sps:$4 sm:$0xff] (!%p297_p6)  }
  0x12   : > { %s341_s20 = scalar_select %p340_p7, %s3446_s11, 62  ;;  %v3034_v36 = vld [vmem:[%s4233_s3 + $0x50] ss:$8 sps:$4 sm:$0xff]   ;;  %v3035_v37 = vld [vmem:[%s4233_s3 + $0x64] ss:$8 sps:$4 sm:$0xff]   ;;  %vm2283_vm3 = vcmask 23552  }
  0x13   : > { %v3037_v38 = vld [vmem:[%s4233_s3 + $0x60] ss:$8 sps:$4 sm:$0xff]   ;;  %v3038_v40 = vld [vmem:[%s4233_s3 + $0x74] ss:$8 sps:$4 sm:$0xff]   ;;  %v3040_v43 = vld [vmem:[%s4233_s3 + $0x70] ss:$8 sps:$4 sm:$0xff]  }
  0x14   : > { %s2661_s21 = sshll.u32 %s341_s20, 3  ;;  %525 = vmatpush1.bf16.msra.mxu0 %v3013_v9  ;;  %1016 = vmatpush1.bf16.msra.mxu1 %v3022_v22  ;;  %v3041_v44 = vld [vmem:[%s4233_s3 + $0x84] ss:$8 sps:$4 sm:$0xff]   ;;  %v3043_v45 = vld [vmem:[%s4233_s3 + $0x80] ss:$8 sps:$4 sm:$0xff]   ;;  %s332_s14 = sand.u32 1, %s3303_s30  }
  0x15   : > { %s3459_s24 = scalar_lea.vmem %s4230_s0, %s2661_s21  ;;  %526 = vmatprep.subr.bf16.mxu0 %v518_v12  ;;  %1017 = vmatprep.subr.bf16.mxu1 %v3023_v24  ;;  %v3044_v47 = vld [vmem:[%s4233_s3 + $0x94] ss:$8 sps:$4 sm:$0xff]   ;;  %v3046_v50 = vld [vmem:[%s4233_s3 + $0x90] ss:$8 sps:$4 sm:$0xff]   ;;  %v3047_v51 = vld [vmem:[%s4233_s3 + $0xa4] ss:$8 sps:$4 sm:$0xff]  }
  0x16   : > { %v355_v17 = vld [vmem:[%s3459_s24] sm:$0xff]  ;;  %v356_v18 = vld [vmem:[%s3459_s24 + $0x8] sm:$0xff]  ;;  %v357_v20 = vld [vmem:[%s3459_s24 + $0x10] sm:$0xff]  ;;  %s2324_s15 = ssub.s32 (%p3422_p4), 63, %s3446_s11  ;;  %s2784_s18 = sshll.u32 (%p3422_p4), %s3410_s12, 8 }
  0x17   : > { %v387_v19 = vpack.c.bf16 %v356_v18, %v355_v17  ;;  %v358_v21 = vld [vmem:[%s3459_s24 + $0x18] sm:$0xff]  ;;  %v359_v27 = vld [vmem:[%s3459_s24 + $0x20] sm:$0xff]  ;;  %v360_v28 = vld [vmem:[%s3459_s24 + $0x28] sm:$0xff]  ;;  %p2325_p8 = scmp.lt.s32.totalorder (%p3422_p4), %s2324_s15, 32  ;;  %s4098_s21 = scalar_lea.vmem (%p3422_p4), %s4239_s9, %s2784_s18  }
  0x18   : > { %527 = vmatpush1.bf16.msra.mxu0 %v515_v16  ;;  %v388_v23 = vpack.c.bf16 %v358_v21, %v357_v20  ;;  %1018 = vmatpush1.bf16.msra.mxu1 %v3025_v25  ;;  %v389_v31 = vpack.c.bf16 %v360_v28, %v359_v27  ;;  %v361_v34 = vld [vmem:[%s3459_s24 + $0x30] sm:$0xff]  ;;  %v362_v35 = vld [vmem:[%s3459_s24 + $0x38] sm:$0xff]  ;;  %v363_v41 = vld [vmem:[%s3459_s24 + $0x40] sm:$0xff] }
  0x19   : > { %1019 = vmatprep.subr.bf16.mxu1 %v3026_v26  ;;  %v390_v39 = vpack.c.bf16 %v362_v35, %v361_v34  ;;  %v364_v42 = vld [vmem:[%s3459_s24 + $0x48] sm:$0xff]  ;;  %v365_v48 = vld [vmem:[%s3459_s24 + $0x50] sm:$0xff]  ;;  %v366_v49 = vld [vmem:[%s3459_s24 + $0x58] sm:$0xff] }
  0x1a   : > { %v391_v46 = vpack.c.bf16 %v364_v42, %v363_v41  ;;  %v3049_v52 = vld [vmem:[%s4233_s3 + $0xa0] ss:$8 sps:$4 sm:$0xff]   ;;  %v392_v53 = vpack.c.bf16 %v366_v49, %v365_v48  ;;  %v3050_v54 = vld [vmem:[%s4233_s3 + $0xb4] ss:$8 sps:$4 sm:$0xff]   ;;  %v3052_v57 = vld [vmem:[%s4233_s3 + $0xb0] ss:$8 sps:$4 sm:$0xff]  }
  0x1b   : > { %2670 = vmatmul.mubr.msk.bf16.vlgmr.msra.gmra.mrb[0].mxu0 %vm461_vm2, %v387_v19  ;;  %v367_v55 = vld [vmem:[%s3459_s24 + $0x60] sm:$0xff]  ;;  %v368_v56 = vld [vmem:[%s3459_s24 + $0x68] sm:$0xff]  ;;  %v3056_v61 = vld [vmem:[%s4233_s3 + $0xd4] ss:$8 sps:$4 sm:$0xff]  }
  0x1c   : > { %562 = vmatprep.mubr.bf16.mxu0 %v3346_v5  ;;  %1020 = vmatpush1.bf16.msra.mxu1 %v3028_v29  ;;  %v3053_v58 = vld [vmem:[%s4233_s3 + $0xc4] ss:$8 sps:$4 sm:$0xff]   ;;  %v393_v59 = vpack.c.bf16 %v368_v56, %v367_v55  ;;  %v3055_v60 = vld [vmem:[%s4233_s3 + $0xc0] ss:$8 sps:$4 sm:$0xff]   ;;  %v369_v62 = vld [vmem:[%s3459_s24 + $0x70] sm:$0xff] }
  0x1d   : > { %1021 = vmatprep.subr.bf16.mxu1 %v3029_v30  ;;  %v370_v63 = vld [vmem:[%s3459_s24 + $0x78] sm:$0xff]  ;;  %v371_v1 = vld [vmem:[%s3459_s24 + $0x80] sm:$0xff]  ;;  %v372_v2 = vld [vmem:[%s3459_s24 + $0x88] sm:$0xff] }
  0x1e   : > { %v394_v0 = vpack.c.bf16 %v370_v63, %v369_v62  ;;  %v395_v3 = vpack.c.bf16 %v372_v2, %v371_v1  ;;  %v373_v4 = vld [vmem:[%s3459_s24 + $0x90] sm:$0xff]  ;;  %v374_v6 = vld [vmem:[%s3459_s24 + $0x98] sm:$0xff]  ;;  %v375_v8 = vld [vmem:[%s3459_s24 + $0xa0] sm:$0xff] }
  0x1f   : > { %v396_v7 = vpack.c.bf16 %v374_v6, %v373_v4  ;;  %v376_v9 = vld [vmem:[%s3459_s24 + $0xa8] sm:$0xff]  ;;  %v377_v11 = vld [vmem:[%s3459_s24 + $0xb0] sm:$0xff]  ;;  %v378_v12 = vld [vmem:[%s3459_s24 + $0xb8] sm:$0xff] }
  0x20   : > { %1022 = vmatpush1.bf16.msra.mxu1 %v3031_v32  ;;  %v397_v10 = vpack.c.bf16 %v376_v9, %v375_v8  ;;  %v3058_v13 = vld [vmem:[%s4233_s3 + $0xd0] ss:$8 sps:$4 sm:$0xff]   ;;  %v398_v14 = vpack.c.bf16 %v378_v12, %v377_v11  ;;  %v3059_v15 = vld [vmem:[%s4233_s3 + $0xe4] ss:$8 sps:$4 sm:$0xff]   ;;  %v3061_v16 = vld [vmem:[%s4233_s3 + $0xe0] ss:$8 sps:$4 sm:$0xff]  }
  0x21   : > { %1023 = vmatprep.subr.bf16.mxu1 %v3032_v33  ;;  %v3062_v17 = vld [vmem:[%s4233_s3 + $0xf4] ss:$8 sps:$4 sm:$0xff]   ;;  %v379_v18 = vld [vmem:[%s3459_s24 + $0xc0] sm:$0xff]  ;;  %v380_v19 = vld [vmem:[%s3459_s24 + $0xc8] sm:$0xff]  ;;  %v413_v33 = vlaneseq }
  0x22   : > { %v3064_v20 = vld [vmem:[%s4233_s3 + $0xf0] ss:$8 sps:$4 sm:$0xff]   ;;  %v399_v21 = vpack.c.bf16 %v380_v19, %v379_v18  ;;  %v383_v25 = vld [vmem:[%s3459_s24 + $0xe0] sm:$0xff]  ;;  %v384_v26 = vld [vmem:[%s3459_s24 + $0xe8] sm:$0xff] }
  0x23   : > { %2671 = vmatmul.mubr.msk.bf16.gmra.mrb[4].mxu0 %vm461_vm2, %v388_v23  ;;  %v381_v22 = vld [vmem:[%s3459_s24 + $0xd0] sm:$0xff]  ;;  %v382_v23 = vld [vmem:[%s3459_s24 + $0xd8] sm:$0xff]  ;;  %v401_v27 = vpack.c.bf16 %v384_v26, %v383_v25  ;;  %v3067_v32 = vld [vmem:[%s4235_s5 + $0x4] ss:$8 sps:$4 sm:$0xff]   ;;  %v414_v35 = vshrl.u32 %v413_v33, 7 }
  0x24   : > { %572 = vmatprep.mubr.bf16.mxu0 %v3346_v5  ;;  %1024 = vmatpush1.bf16.msra.mxu1 %v3034_v36  ;;  %v400_v24 = vpack.c.bf16 %v382_v23, %v381_v22  ;;  %v385_v28 = vld [vmem:[%s3459_s24 + $0xf0] sm:$0xff]  ;;  %v386_v29 = vld [vmem:[%s3459_s24 + $0xf8] sm:$0xff]  ;;  %v3083_v8 = vld [vmem:[%s4235_s5 + $0x60] ss:$8 sps:$4 sm:$0xff]   ;;  %s2659_s24 = sshll.u32 %s332_s14, 8 }
  0x25   : > { %1025 = vmatprep.subr.bf16.mxu1 %v3035_v37  ;;  %v402_v30 = vpack.c.bf16 %v386_v29, %v385_v28  ;;  %1506 = vmatprep.subr.bf16.mxu0 %v3067_v32  ;;  %v3070_v34 = vld [vmem:[%s4235_s5 + $0x14] ss:$8 sps:$4 sm:$0xff]   ;;  %v3632_v36 = vsub.s32 0, %v414_v35  ;;  %v411_v37 = vld [vmem:[%s4232_s2] sm:$0x3]  ;;  %s4001_s30 = scalar_lea.vmem [#allocation2], %s2659_s24  }
  0x26   : > { %v3082_v55 = vld [vmem:[%s4235_s5 + $0x54] ss:$8 sps:$4 sm:$0xff]   ;;  %v3091_v19 = vld [vmem:[%s4235_s5 + $0x84] ss:$8 sps:$4 sm:$0xff]   ;;  %v3089_v26 = vld [vmem:[%s4235_s5 + $0x80] ss:$8 sps:$4 sm:$0xff]  }
  0x27   : > { %v3646_v41 = vrot.slane %v411_v37, %v3632_v36  ;;  %v3094_v28 = vld [vmem:[%s4235_s5 + $0x94] ss:$8 sps:$4 sm:$0xff]  }
  0x28   : > { %1026 = vmatpush1.bf16.msra.mxu1 %v3037_v38  ;;  %v3637_v38 = vsub.s32 1, %v414_v35 }
  0x29   : > { %1027 = vmatprep.subr.bf16.mxu1 %v3038_v40  ;;  %v3073_v40 = vld [vmem:[%s4235_s5 + $0x24] ss:$8 sps:$4 sm:$0xff]  }
  0x2a   : > { %v3649_v42 = vrot.slane %v411_v37, %v3637_v38  ;;  %v3097_v37 = vld [vmem:[%s4235_s5 + $0xa4] ss:$8 sps:$4 sm:$0xff]  }
  0x2b   : > { %2672 = vmatmul.mubr.msk.bf16.gmra.mrb[8].mxu0 %vm461_vm2, %v389_v31  ;;  %v3065_v31 = vld [vmem:[%s4235_s5] ss:$8 sps:$4 sm:$0xff]  }
  0x2c   : > { %582 = vmatprep.mubr.bf16.mxu0 %v3346_v5  ;;  %1028 = vmatpush1.bf16.msra.mxu1 %v3040_v43 }
  0x2d   : > { %1029 = vmatprep.subr.bf16.mxu1 %v3041_v44  ;;  %1507 = vmatpush1.bf16.msra.mxu0 %v3065_v31  ;;  %v3074_v44 = vld [vmem:[%s4235_s5 + $0x30] ss:$8 sps:$4 sm:$0xff]  }
  0x2e   : > { %1508 = vmatprep.subr.bf16.mxu0 %v3070_v34 }
  0x30   : > { %1030 = vmatpush1.bf16.msra.mxu1 %v3043_v45  ;;  %v3076_v45 = vld [vmem:[%s4235_s5 + $0x34] ss:$8 sps:$4 sm:$0xff]  }
  0x31   : > { %1031 = vmatprep.subr.bf16.mxu1 %v3044_v47 }
  0x33   : > { %2673 = vmatmul.mubr.msk.bf16.gmra.mrb[12].mxu0 %vm461_vm2, %v390_v39  ;;  %v3071_v39 = vld [vmem:[%s4235_s5 + $0x20] ss:$8 sps:$4 sm:$0xff]  }
  0x34   : > { %592 = vmatprep.mubr.bf16.mxu0 %v3346_v5  ;;  %1032 = vmatpush1.bf16.msra.mxu1 %v3046_v50 }
  0x35   : > { %1033 = vmatprep.subr.bf16.mxu1 %v3047_v51 }
  0x38   : > { %1034 = vmatpush1.bf16.msra.mxu1 %v3049_v52  ;;  %v3077_v52 = vld [vmem:[%s4235_s5 + $0x40] ss:$8 sps:$4 sm:$0xff]  }
  0x39   : > { %1035 = vmatprep.subr.bf16.mxu1 %v3050_v54 }
  0x3b   : > { %2674 = vmatmul.mubr.msk.bf16.gmra.mrb[16].mxu0 %vm461_vm2, %v391_v46 }
  0x3c   : > { %602 = vmatprep.mubr.bf16.mxu0 %v3346_v5  ;;  %1036 = vmatpush1.bf16.msra.mxu1 %v3052_v57 }
  0x3d   : > { %1037 = vmatprep.subr.bf16.mxu1 %v3053_v58 }
  0x40   : > { %1038 = vmatpush1.bf16.msra.mxu1 %v3055_v60 }
  0x41   : > { %1039 = vmatprep.subr.bf16.mxu1 %v3056_v61  ;;  %v3080_v61 = vld [vmem:[%s4235_s5 + $0x50] ss:$8 sps:$4 sm:$0xff]  }
  0x43   : > { %2675 = vmatmul.mubr.msk.bf16.gmra.mrb[20].mxu0 %vm461_vm2, %v392_v53  ;;  %v3079_v53 = vld [vmem:[%s4235_s5 + $0x44] ss:$8 sps:$4 sm:$0xff]  }
  0x44   : > { %612 = vmatprep.mubr.bf16.mxu0 %v3346_v5  ;;  %1040 = vmatpush1.bf16.msra.mxu1 %v3058_v13 }
  0x45   : > { %1041 = vmatprep.subr.bf16.mxu1 %v3059_v15 }
  0x48   : > { %1042 = vmatpush1.bf16.msra.mxu1 %v3061_v16  ;;  %v3086_v16 = vld [vmem:[%s4235_s5 + $0x70] ss:$8 sps:$4 sm:$0xff]  }
  0x49   : > { %1043 = vmatprep.subr.bf16.mxu1 %v3062_v17 }
  0x4b   : > { %2676 = vmatmul.mubr.msk.bf16.gmra.mrb[24].mxu0 %vm461_vm2, %v393_v59 }
  0x4c   : > { %622 = vmatprep.mubr.bf16.mxu0 %v3346_v5  ;;  %1044 = vmatpush1.bf16.msra.mxu1 %v3064_v20 }
  0x53   : > { %2677 = vmatmul.mubr.msk.bf16.gmra.mrb[28].mxu0 %vm461_vm2, %v394_v0  ;;  %v3085_v0 = vld [vmem:[%s4235_s5 + $0x64] ss:$8 sps:$4 sm:$0xff]  }
  0x54   : > { %632 = vmatprep.mubr.bf16.mxu0 %v3346_v5 }
  0x5b   : > { %2678 = vmatmul.mubr.msk.bf16.gmra.mrb[32].mxu0 %vm461_vm2, %v395_v3 }
  0x5c   : > { %642 = vmatprep.mubr.bf16.mxu0 %v3346_v5 }
  0x63   : > { %2679 = vmatmul.mubr.msk.bf16.gmra.mrb[36].mxu0 %vm461_vm2, %v396_v7 }
  0x64   : > { %652 = vmatprep.mubr.bf16.mxu0 %v3346_v5 }
  0x6b   : > { %2680 = vmatmul.mubr.msk.bf16.gmra.mrb[40].mxu0 %vm461_vm2, %v397_v10  ;;  %v3088_v10 = vld [vmem:[%s4235_s5 + $0x74] ss:$8 sps:$4 sm:$0xff]  }
  0x6c   : > { %662 = vmatprep.mubr.bf16.mxu0 %v3346_v5 }
  0x73   : > { %2681 = vmatmul.mubr.msk.bf16.gmra.mrb[44].mxu0 %vm461_vm2, %v398_v14 }
  0x74   : > { %672 = vmatprep.mubr.bf16.mxu0 %v3346_v5 }
  0x7b   : > { %2682 = vmatmul.mubr.msk.bf16.gmra.mrb[48].mxu0 %vm461_vm2, %v399_v21 }
  0x7c   : > { %682 = vmatprep.mubr.bf16.mxu0 %v3346_v5 }
  0x83   : > { %2683 = vmatmul.mubr.msk.bf16.gmra.mrb[52].mxu0 %vm461_vm2, %v400_v24 }
  0x84   : > { %692 = vmatprep.mubr.bf16.mxu0 %v3346_v5 }
  0x8b   : > { %2684 = vmatmul.mubr.msk.bf16.gmra.mrb[56].mxu0 %vm461_vm2, %v401_v27 }
  0x8c   : > { %702 = vmatprep.mubr.bf16.mxu0 %v3346_v5  ;;  %v3068_v5 = vld [vmem:[%s4235_s5 + $0x10] ss:$8 sps:$4 sm:$0xff]  }
  0x8d   : > { %1509 = vmatpush1.bf16.msra.mxu0 %v3068_v5  ;;  %v3092_v5 = vld [vmem:[%s4235_s5 + $0x90] ss:$8 sps:$4 sm:$0xff]  }
  0x8e   : > { %1510 = vmatprep.subr.bf16.mxu0 %v3073_v40 }
  0x91   : > { %1511 = vmatpush1.bf16.msra.mxu0 %v3071_v39 }
  0x92   : > { %1512 = vmatprep.subr.bf16.mxu0 %v3076_v45 }
  0x93   : > { %2685 = vmatmul.mubr.msk.bf16.gmra.mrb[60].mxu0 %vm461_vm2, %v402_v30 }
  0x95   : > { %1513 = vmatpush1.bf16.msra.mxu0 %v3074_v44 }
  0x96   : > { %1514 = vmatprep.subr.bf16.mxu0 %v3079_v53 }
  0x99   : > { %1515 = vmatpush1.bf16.msra.mxu0 %v3077_v52 }
  0x9a   : > { %1516 = vmatprep.subr.bf16.mxu0 %v3082_v55  ;;  %v3098_v55 = vld [vmem:[%s4235_s5 + $0xb0] ss:$8 sps:$4 sm:$0xff]  }
  0x9d   : > { %1517 = vmatpush1.bf16.msra.mxu0 %v3080_v61 }
  0x9e   : > { %1518 = vmatprep.subr.bf16.mxu0 %v3085_v0 }
  0xa1   : > { %1519 = vmatpush1.bf16.msra.mxu0 %v3083_v8 }
  0xa2   : > { %1520 = vmatprep.subr.bf16.mxu0 %v3088_v10  ;;  %v3104_v10 = vld [vmem:[%s4235_s5 + $0xd0] ss:$8 sps:$4 sm:$0xff]  }
  0xa5   : > { %1521 = vmatpush1.bf16.msra.mxu0 %v3086_v16 }
  0xa6   : > { %1522 = vmatprep.subr.bf16.mxu0 %v3091_v19 }
  0xa9   : > { %1523 = vmatpush1.bf16.msra.mxu0 %v3089_v26 }
  0xaa   : > { %1524 = vmatprep.subr.bf16.mxu0 %v3094_v28 }
  0xad   : > { %1525 = vmatpush1.bf16.msra.mxu0 %v3092_v5 }
  0xae   : > { %1526 = vmatprep.subr.bf16.mxu0 %v3097_v37 }
  0xee   : > { %v554_v43 = vpop.f32.mrb[0].mxu0 }
  0xef   : > { %v555_v46 = vadd.f32 %v554_v43, %v3646_v41  ;;  %v556_v47 = vpop.f32.mrb[1].mxu0 }
  0xf0   : > { %v557_v48 = vadd.f32 %v556_v47, %v3649_v42  ;;  %v558_v49 = vpop.f32.mrb[2].mxu0  ;;  %v3095_v47 = vld [vmem:[%s4235_s5 + $0xa0] ss:$8 sps:$4 sm:$0xff]  }
  0xf1   : > { %v559_v50 = vadd.f32 %v558_v49, %v3646_v41  ;;  %v560_v51 = vpop.f32.mrb[3].mxu0  ;;  %v713_v56 = vmax.f32 %v555_v46, 0.0  ;;  %v3100_v49 = vld [vmem:[%s4235_s5 + $0xb4] ss:$8 sps:$4 sm:$0xff]   ;;  %1527 = vmatpush1.bf16.msra.mxu0 %v3095_v47 }
  0xf2   : > { %v561_v54 = vadd.f32 %v560_v51, %v3649_v42  ;;  %v714_v58 = vmax.f32 %v557_v48, 0.0  ;;  %1528 = vmatprep.subr.bf16.mxu0 %v3100_v49 }
  0xf3   : > { %v715_v57 = vmax.f32 %v559_v50, 0.0 }
  0xf4   : > { %v716_v59 = vmax.f32 %v561_v54, 0.0 }
  0xf5   : > { %v777_v60 = vpack.c.bf16 %v715_v57, %v713_v56  ;;  %1529 = vmatpush1.bf16.msra.mxu0 %v3098_v55 }
  0xf6   : > { %v564_v62 = vpop.f32.mrb[4].mxu0  ;;  %v778_v63 = vpack.c.bf16 %v716_v59, %v714_v58  ;;  %v3103_v58 = vld [vmem:[%s4235_s5 + $0xc4] ss:$8 sps:$4 sm:$0xff]  }
  0xf7   : > { %v565_v1 = vadd.f32 %v564_v62, %v3646_v41  ;;  %v566_v2 = vpop.f32.mrb[5].mxu0  ;;  %1530 = vmatprep.subr.bf16.mxu0 %v3103_v58 }
  0xf8   : > { %v567_v3 = vadd.f32 %v566_v2, %v3649_v42  ;;  %v568_v4 = vpop.f32.mrb[6].mxu0  ;;  %1045 = vmatprep.mubr.bf16.mxu1 %v778_v63 }
  0xf9   : > { %v569_v6 = vadd.f32 %v568_v4, %v3646_v41  ;;  %v570_v7 = vpop.f32.mrb[7].mxu0  ;;  %1046 = vmatmul.mubr.bf16.vlgmr.msra.gmra.mrb[0].mxu1 %v777_v60  ;;  %v717_v11 = vmax.f32 %v565_v1, 0.0  ;;  %v3101_v1 = vld [vmem:[%s4235_s5 + $0xc0] ss:$8 sps:$4 sm:$0xff]  }
  0xfa   : > { %v571_v9 = vadd.f32 %v570_v7, %v3649_v42  ;;  %v718_v13 = vmax.f32 %v567_v3, 0.0  ;;  %v3106_v3 = vld [vmem:[%s4235_s5 + $0xd4] ss:$8 sps:$4 sm:$0xff]   ;;  %1531 = vmatpush1.bf16.msra.mxu0 %v3101_v1 }
  0xfb   : > { %v719_v12 = vmax.f32 %v569_v6, 0.0  ;;  %1532 = vmatprep.subr.bf16.mxu0 %v3106_v3 }
  0xfc   : > { %v720_v14 = vmax.f32 %v571_v9, 0.0 }
  0xfd   : > { %v779_v15 = vpack.c.bf16 %v719_v12, %v717_v11 }
  0xfe   : > { %v780_v17 = vpack.c.bf16 %v720_v14, %v718_v13  ;;  %v574_v18 = vpop.f32.mrb[8].mxu0  ;;  %v3109_v13 = vld [vmem:[%s4235_s5 + $0xe4] ss:$8 sps:$4 sm:$0xff]   ;;  %1533 = vmatpush1.bf16.msra.mxu0 %v3104_v10 }
  0xff   : > { %v575_v20 = vadd.f32 %v574_v18, %v3646_v41  ;;  %v576_v21 = vpop.f32.mrb[9].mxu0  ;;  %1534 = vmatprep.subr.bf16.mxu0 %v3109_v13 }
 0x100   : > { %v577_v22 = vadd.f32 %v576_v21, %v3649_v42  ;;  %v578_v23 = vpop.f32.mrb[10].mxu0  ;;  %1055 = vmatprep.mubr.bf16.mxu1 %v780_v17 }
 0x101   : > { %v579_v24 = vadd.f32 %v578_v23, %v3646_v41  ;;  %v580_v25 = vpop.f32.mrb[11].mxu0  ;;  %1056 = vmatmul.mubr.bf16.gmra.mrb[4].mxu1 %v779_v15  ;;  %v721_v29 = vmax.f32 %v575_v20, 0.0  ;;  %v3107_v20 = vld [vmem:[%s4235_s5 + $0xe0] ss:$8 sps:$4 sm:$0xff]  }
 0x102   : > { %v581_v27 = vadd.f32 %v580_v25, %v3649_v42  ;;  %v722_v31 = vmax.f32 %v577_v22, 0.0  ;;  %1535 = vmatpush1.bf16.msra.mxu0 %v3107_v20 }
 0x103   : > { %v723_v30 = vmax.f32 %v579_v24, 0.0 }
 0x104   : > { %v724_v32 = vmax.f32 %v581_v27, 0.0 }
 0x105   : > { %v781_v33 = vpack.c.bf16 %v723_v30, %v721_v29 }
 0x106   : > { %v782_v34 = vpack.c.bf16 %v724_v32, %v722_v31  ;;  %v584_v35 = vpop.f32.mrb[12].mxu0 }
 0x107   : > { %v585_v39 = vadd.f32 %v584_v35, %v3646_v41  ;;  %v586_v40 = vpop.f32.mrb[13].mxu0 }
 0x108   : > { %v587_v43 = vadd.f32 %v586_v40, %v3649_v42  ;;  %v588_v44 = vpop.f32.mrb[14].mxu0  ;;  %1065 = vmatprep.mubr.bf16.mxu1 %v782_v34 }
 0x109   : > { %v589_v45 = vadd.f32 %v588_v44, %v3646_v41  ;;  %v590_v46 = vpop.f32.mrb[15].mxu0  ;;  %1066 = vmatmul.mubr.bf16.gmra.mrb[8].mxu1 %v781_v33  ;;  %v725_v50 = vmax.f32 %v585_v39, 0.0 }
 0x10a   : > { %v591_v48 = vadd.f32 %v590_v46, %v3649_v42  ;;  %v726_v52 = vmax.f32 %v587_v43, 0.0 }
 0x10b   : > { %v727_v51 = vmax.f32 %v589_v45, 0.0 }
 0x10c   : > { %v728_v53 = vmax.f32 %v591_v48, 0.0 }
 0x10d   : > { %v783_v54 = vpack.c.bf16 %v727_v51, %v725_v50 }
 0x10e   : > { %v784_v56 = vpack.c.bf16 %v728_v53, %v726_v52  ;;  %v594_v57 = vpop.f32.mrb[16].mxu0 }
 0x10f   : > { %v595_v59 = vadd.f32 %v594_v57, %v3646_v41  ;;  %v596_v60 = vpop.f32.mrb[17].mxu0 }
 0x110   : > { %v597_v61 = vadd.f32 %v596_v60, %v3649_v42  ;;  %v598_v62 = vpop.f32.mrb[18].mxu0  ;;  %1075 = vmatprep.mubr.bf16.mxu1 %v784_v56 }
 0x111   : > { %v599_v63 = vadd.f32 %v598_v62, %v3646_v41  ;;  %v600_v0 = vpop.f32.mrb[19].mxu0  ;;  %1076 = vmatmul.mubr.bf16.gmra.mrb[12].mxu1 %v783_v54  ;;  %v729_v4 = vmax.f32 %v595_v59, 0.0 }
 0x112   : > { %v601_v2 = vadd.f32 %v600_v0, %v3649_v42  ;;  %v730_v7 = vmax.f32 %v597_v61, 0.0 }
 0x113   : > { %v731_v6 = vmax.f32 %v599_v63, 0.0 }
 0x114   : > { %v732_v8 = vmax.f32 %v601_v2, 0.0 }
 0x115   : > { %v785_v9 = vpack.c.bf16 %v731_v6, %v729_v4 }
 0x116   : > { %v786_v11 = vpack.c.bf16 %v732_v8, %v730_v7  ;;  %v604_v12 = vpop.f32.mrb[20].mxu0 }
 0x117   : > { %v605_v14 = vadd.f32 %v604_v12, %v3646_v41  ;;  %v606_v15 = vpop.f32.mrb[21].mxu0 }
 0x118   : > { %v607_v16 = vadd.f32 %v606_v15, %v3649_v42  ;;  %v608_v17 = vpop.f32.mrb[22].mxu0  ;;  %1085 = vmatprep.mubr.bf16.mxu1 %v786_v11 }
 0x119   : > { %v609_v18 = vadd.f32 %v608_v17, %v3646_v41  ;;  %v610_v19 = vpop.f32.mrb[23].mxu0  ;;  %1086 = vmatmul.mubr.bf16.gmra.mrb[16].mxu1 %v785_v9  ;;  %v733_v22 = vmax.f32 %v605_v14, 0.0 }
 0x11a   : > { %v611_v21 = vadd.f32 %v610_v19, %v3649_v42  ;;  %v734_v24 = vmax.f32 %v607_v16, 0.0 }
 0x11b   : > { %v735_v23 = vmax.f32 %v609_v18, 0.0 }
 0x11c   : > { %v736_v25 = vmax.f32 %v611_v21, 0.0 }
 0x11d   : > { %v787_v26 = vpack.c.bf16 %v735_v23, %v733_v22 }
 0x11e   : > { %v788_v27 = vpack.c.bf16 %v736_v25, %v734_v24  ;;  %v614_v28 = vpop.f32.mrb[24].mxu0 }
 0x11f   : > { %v615_v29 = vadd.f32 %v614_v28, %v3646_v41  ;;  %v616_v30 = vpop.f32.mrb[25].mxu0 }
 0x120   : > { %v617_v31 = vadd.f32 %v616_v30, %v3649_v42  ;;  %v618_v32 = vpop.f32.mrb[26].mxu0  ;;  %1095 = vmatprep.mubr.bf16.mxu1 %v788_v27 }
 0x121   : > { %v619_v33 = vadd.f32 %v618_v32, %v3646_v41  ;;  %v620_v5 = vpop.f32.mrb[27].mxu0  ;;  %1096 = vmatmul.mubr.bf16.gmra.mrb[20].mxu1 %v787_v26  ;;  %v737_v35 = vmax.f32 %v615_v29, 0.0 }
 0x122   : > { %v621_v34 = vadd.f32 %v620_v5, %v3649_v42  ;;  %v738_v39 = vmax.f32 %v617_v31, 0.0 }
 0x123   : > { %v739_v37 = vmax.f32 %v619_v33, 0.0 }
 0x124   : > { %v740_v40 = vmax.f32 %v621_v34, 0.0 }
 0x125   : > { %v789_v43 = vpack.c.bf16 %v739_v37, %v737_v35 }
 0x126   : > { %v790_v44 = vpack.c.bf16 %v740_v40, %v738_v39  ;;  %v624_v45 = vpop.f32.mrb[28].mxu0 }
 0x127   : > { %v625_v46 = vadd.f32 %v624_v45, %v3646_v41  ;;  %v626_v47 = vpop.f32.mrb[29].mxu0 }
 0x128   : > { %v627_v48 = vadd.f32 %v626_v47, %v3649_v42  ;;  %v628_v49 = vpop.f32.mrb[30].mxu0  ;;  %1105 = vmatprep.mubr.bf16.mxu1 %v790_v44 }
 0x129   : > { %v629_v50 = vadd.f32 %v628_v49, %v3646_v41  ;;  %v630_v51 = vpop.f32.mrb[31].mxu0  ;;  %1106 = vmatmul.mubr.bf16.gmra.mrb[24].mxu1 %v789_v43  ;;  %v741_v53 = vmax.f32 %v625_v46, 0.0 }
 0x12a   : > { %v631_v52 = vadd.f32 %v630_v51, %v3649_v42  ;;  %v742_v55 = vmax.f32 %v627_v48, 0.0 }
 0x12b   : > { %v743_v54 = vmax.f32 %v629_v50, 0.0 }
 0x12c   : > { %v744_v56 = vmax.f32 %v631_v52, 0.0 }
 0x12d   : > { %v791_v57 = vpack.c.bf16 %v743_v54, %v741_v53 }
 0x12e   : > { %v792_v58 = vpack.c.bf16 %v744_v56, %v742_v55  ;;  %v634_v59 = vpop.f32.mrb[32].mxu0 }
 0x12f   : > { %v635_v60 = vadd.f32 %v634_v59, %v3646_v41  ;;  %v636_v61 = vpop.f32.mrb[33].mxu0 }
 0x130   : > { %v637_v62 = vadd.f32 %v636_v61, %v3649_v42  ;;  %v638_v63 = vpop.f32.mrb[34].mxu0  ;;  %1115 = vmatprep.mubr.bf16.mxu1 %v792_v58 }
 0x131   : > { %v639_v0 = vadd.f32 %v638_v63, %v3646_v41  ;;  %v640_v1 = vpop.f32.mrb[35].mxu0  ;;  %1116 = vmatmul.mubr.bf16.gmra.mrb[28].mxu1 %v791_v57  ;;  %v745_v3 = vmax.f32 %v635_v60, 0.0 }
 0x132   : > { %v641_v2 = vadd.f32 %v640_v1, %v3649_v42  ;;  %v746_v6 = vmax.f32 %v637_v62, 0.0  ;;  %v3112_v62 = vld [vmem:[%s4235_s5 + $0xf4] ss:$8 sps:$4 sm:$0xff]  }
 0x133   : > { %v747_v4 = vmax.f32 %v639_v0, 0.0  ;;  %v3110_v0 = vld [vmem:[%s4235_s5 + $0xf0] ss:$8 sps:$4 sm:$0xff]   ;;  %1536 = vmatprep.subr.bf16.mxu0 %v3112_v62 }
 0x134   : > { %v748_v7 = vmax.f32 %v641_v2, 0.0  ;;  %1537 = vmatpush1.bf16.msra.mxu0 %v3110_v0 }
 0x135   : > { %v793_v8 = vpack.c.bf16 %v747_v4, %v745_v3 }
 0x136   : > { %v794_v9 = vpack.c.bf16 %v748_v7, %v746_v6  ;;  %v644_v10 = vpop.f32.mrb[36].mxu0 }
 0x137   : > { %v645_v11 = vadd.f32 %v644_v10, %v3646_v41  ;;  %v646_v12 = vpop.f32.mrb[37].mxu0 }
 0x138   : > { %v647_v13 = vadd.f32 %v646_v12, %v3649_v42  ;;  %v648_v14 = vpop.f32.mrb[38].mxu0  ;;  %1125 = vmatprep.mubr.bf16.mxu1 %v794_v9 }
 0x139   : > { %v649_v15 = vadd.f32 %v648_v14, %v3646_v41  ;;  %v650_v16 = vpop.f32.mrb[39].mxu0  ;;  %1126 = vmatmul.mubr.bf16.gmra.mrb[32].mxu1 %v793_v8  ;;  %v749_v18 = vmax.f32 %v645_v11, 0.0 }
 0x13a   : > { %v651_v17 = vadd.f32 %v650_v16, %v3649_v42  ;;  %v750_v20 = vmax.f32 %v647_v13, 0.0 }
 0x13b   : > { %v751_v19 = vmax.f32 %v649_v15, 0.0 }
 0x13c   : > { %v752_v21 = vmax.f32 %v651_v17, 0.0 }
 0x13d   : > { %v795_v22 = vpack.c.bf16 %v751_v19, %v749_v18 }
 0x13e   : > { %v796_v23 = vpack.c.bf16 %v752_v21, %v750_v20  ;;  %v654_v24 = vpop.f32.mrb[40].mxu0 }
 0x13f   : > { %v655_v25 = vadd.f32 %v654_v24, %v3646_v41  ;;  %v656_v26 = vpop.f32.mrb[41].mxu0 }
 0x140   : > { %v657_v27 = vadd.f32 %v656_v26, %v3649_v42  ;;  %v658_v28 = vpop.f32.mrb[42].mxu0  ;;  %1135 = vmatprep.mubr.bf16.mxu1 %v796_v23 }
 0x141   : > { %v659_v29 = vadd.f32 %v658_v28, %v3646_v41  ;;  %v660_v30 = vpop.f32.mrb[43].mxu0  ;;  %1136 = vmatmul.mubr.bf16.gmra.mrb[36].mxu1 %v795_v22  ;;  %v753_v32 = vmax.f32 %v655_v25, 0.0 }
 0x142   : > { %v661_v31 = vadd.f32 %v660_v30, %v3649_v42  ;;  %v754_v5 = vmax.f32 %v657_v27, 0.0 }
 0x143   : > { %v755_v33 = vmax.f32 %v659_v29, 0.0 }
 0x144   : > { %v756_v34 = vmax.f32 %v661_v31, 0.0 }
 0x145   : > { %v797_v35 = vpack.c.bf16 %v755_v33, %v753_v32 }
 0x146   : > { %v798_v37 = vpack.c.bf16 %v756_v34, %v754_v5  ;;  %v664_v39 = vpop.f32.mrb[44].mxu0 }
 0x147   : > { %v665_v40 = vadd.f32 %v664_v39, %v3646_v41  ;;  %v666_v43 = vpop.f32.mrb[45].mxu0 }
 0x148   : > { %v667_v44 = vadd.f32 %v666_v43, %v3649_v42  ;;  %v668_v45 = vpop.f32.mrb[46].mxu0  ;;  %1145 = vmatprep.mubr.bf16.mxu1 %v798_v37 }
 0x149   : > { %v669_v46 = vadd.f32 %v668_v45, %v3646_v41  ;;  %v670_v47 = vpop.f32.mrb[47].mxu0  ;;  %1146 = vmatmul.mubr.bf16.gmra.mrb[40].mxu1 %v797_v35  ;;  %v757_v49 = vmax.f32 %v665_v40, 0.0 }
 0x14a   : > { %v671_v48 = vadd.f32 %v670_v47, %v3649_v42  ;;  %v758_v51 = vmax.f32 %v667_v44, 0.0 }
 0x14b   : > { %v759_v50 = vmax.f32 %v669_v46, 0.0 }
 0x14c   : > { %v760_v52 = vmax.f32 %v671_v48, 0.0 }
 0x14d   : > { %v799_v53 = vpack.c.bf16 %v759_v50, %v757_v49 }
 0x14e   : > { %v800_v54 = vpack.c.bf16 %v760_v52, %v758_v51  ;;  %v674_v55 = vpop.f32.mrb[48].mxu0 }
 0x14f   : > { %v675_v56 = vadd.f32 %v674_v55, %v3646_v41  ;;  %v676_v57 = vpop.f32.mrb[49].mxu0 }
 0x150   : > { %v677_v58 = vadd.f32 %v676_v57, %v3649_v42  ;;  %v678_v59 = vpop.f32.mrb[50].mxu0  ;;  %1155 = vmatprep.mubr.bf16.mxu1 %v800_v54 }
 0x151   : > { %v679_v60 = vadd.f32 %v678_v59, %v3646_v41  ;;  %v680_v61 = vpop.f32.mrb[51].mxu0  ;;  %1156 = vmatmul.mubr.bf16.gmra.mrb[44].mxu1 %v799_v53  ;;  %v761_v1 = vmax.f32 %v675_v56, 0.0  ;;  %v841_v53 = vld [vmem:[%s4234_s4] sm:$0x3] }
 0x152   : > { %v681_v63 = vadd.f32 %v680_v61, %v3649_v42  ;;  %v762_v3 = vmax.f32 %v677_v58, 0.0  ;;  %v3797_v54 = vrot.slane %v841_v53, %v3632_v36  ;;  %v3114_v58 = vld [vmem:[%s4237_s7] sm:$0xff]  }
 0x153   : > { %v763_v2 = vmax.f32 %v679_v60, 0.0 }
 0x154   : > { %v764_v4 = vmax.f32 %v681_v63, 0.0  ;;  %v3115_v63 = vld [vmem:[%s4237_s7 + $0x48] sm:$0xff]  }
 0x155   : > { %v801_v6 = vpack.c.bf16 %v763_v2, %v761_v1 }
 0x156   : > { %v802_v7 = vpack.c.bf16 %v764_v4, %v762_v3  ;;  %v684_v8 = vpop.f32.mrb[52].mxu0  ;;  %v3116_v3 = vld [vmem:[%s4237_s7 + $0x8] sm:$0xff]  }
 0x157   : > { %v685_v9 = vadd.f32 %v684_v8, %v3646_v41  ;;  %v686_v10 = vpop.f32.mrb[53].mxu0 }
 0x158   : > { %v687_v11 = vadd.f32 %v686_v10, %v3649_v42  ;;  %v688_v12 = vpop.f32.mrb[54].mxu0  ;;  %1165 = vmatprep.mubr.bf16.mxu1 %v802_v7  ;;  %v3117_v7 = vld [vmem:[%s4237_s7 + $0x50] sm:$0xff]  }
 0x159   : > { %v689_v13 = vadd.f32 %v688_v12, %v3646_v41  ;;  %v690_v14 = vpop.f32.mrb[55].mxu0  ;;  %1166 = vmatmul.mubr.bf16.gmra.mrb[48].mxu1 %v801_v6  ;;  %v765_v16 = vmax.f32 %v685_v9, 0.0 }
 0x15a   : > { %v691_v15 = vadd.f32 %v690_v14, %v3649_v42  ;;  %v766_v18 = vmax.f32 %v687_v11, 0.0 }
 0x15b   : > { %v767_v17 = vmax.f32 %v689_v13, 0.0  ;;  %v3118_v13 = vld [vmem:[%s4237_s7 + $0x10] sm:$0xff]  }
 0x15c   : > { %v768_v19 = vmax.f32 %v691_v15, 0.0 }
 0x15d   : > { %v803_v20 = vpack.c.bf16 %v767_v17, %v765_v16  ;;  %v3119_v16 = vld [vmem:[%s4237_s7 + $0x58] sm:$0xff]  }
 0x15e   : > { %v804_v21 = vpack.c.bf16 %v768_v19, %v766_v18  ;;  %v694_v22 = vpop.f32.mrb[56].mxu0 }
 0x15f   : > { %v695_v23 = vadd.f32 %v694_v22, %v3646_v41  ;;  %v696_v24 = vpop.f32.mrb[57].mxu0  ;;  %v3120_v22 = vld [vmem:[%s4237_s7 + $0x18] sm:$0xff]  }
 0x160   : > { %v697_v25 = vadd.f32 %v696_v24, %v3649_v42  ;;  %v698_v26 = vpop.f32.mrb[58].mxu0  ;;  %1175 = vmatprep.mubr.bf16.mxu1 %v804_v21 }
 0x161   : > { %v699_v27 = vadd.f32 %v698_v26, %v3646_v41  ;;  %v700_v28 = vpop.f32.mrb[59].mxu0  ;;  %1176 = vmatmul.mubr.bf16.gmra.mrb[52].mxu1 %v803_v20  ;;  %v769_v30 = vmax.f32 %v695_v23, 0.0 }
 0x162   : > { %v701_v29 = vadd.f32 %v700_v28, %v3649_v42  ;;  %v770_v32 = vmax.f32 %v697_v25, 0.0  ;;  %v3121_v25 = vld [vmem:[%s4237_s7 + $0x60] sm:$0xff]  }
 0x163   : > { %v771_v31 = vmax.f32 %v699_v27, 0.0 }
 0x164   : > { %v772_v33 = vmax.f32 %v701_v29, 0.0 }
 0x165   : > { %v805_v5 = vpack.c.bf16 %v771_v31, %v769_v30  ;;  %v3122_v31 = vld [vmem:[%s4237_s7 + $0x20] sm:$0xff]  }
 0x166   : > { %v806_v34 = vpack.c.bf16 %v772_v33, %v770_v32  ;;  %v704_v35 = vpop.f32.mrb[60].mxu0 }
 0x167   : > { %v705_v37 = vadd.f32 %v704_v35, %v3646_v41  ;;  %v706_v39 = vpop.f32.mrb[61].mxu0 }
 0x168   : > { %v707_v40 = vadd.f32 %v706_v39, %v3649_v42  ;;  %v708_v43 = vpop.f32.mrb[62].mxu0  ;;  %1185 = vmatprep.mubr.bf16.mxu1 %v806_v34 }
 0x169   : > { %v709_v44 = vadd.f32 %v708_v43, %v3646_v41  ;;  %v710_v45 = vpop.f32.mrb[63].mxu0  ;;  %1186 = vmatmul.mubr.bf16.gmra.mrb[56].mxu1 %v805_v5  ;;  %v773_v47 = vmax.f32 %v705_v37, 0.0  ;;  %v3800_v41 = vrot.slane %v841_v53, %v3637_v38  ;;  %v3123_v5 = vld [vmem:[%s4237_s7 + $0x68] sm:$0xff]  }
 0x16a   : > { %v711_v46 = vadd.f32 %v710_v45, %v3649_v42  ;;  %v774_v49 = vmax.f32 %v707_v40, 0.0  ;;  %v3113_v42 = vld [vmem:[%s4237_s7 + $0x40] sm:$0xff]   ;;  %v3124_v43 = vld [vmem:[%s4237_s7 + $0x28] sm:$0xff]  }
 0x16b   : > { %v775_v48 = vmax.f32 %v709_v44, 0.0  ;;  %2899 = vmatprep.subr.bf16.mxu1 %v3113_v42  ;;  %2787 = vmatprep.subr.bf16.mxu0 %v3113_v42 }
 0x16c   : > { %v776_v50 = vmax.f32 %v711_v46, 0.0  ;;  %2907 = vmatpush3.bf16.msra.mxu1 %v3114_v58 }
 0x16d   : > { %v807_v51 = vpack.c.bf16 %v775_v48, %v773_v47  ;;  %2900 = vmatprep.subr.bf16.mxu1 %v3115_v63 }
 0x16e   : > { %v808_v52 = vpack.c.bf16 %v776_v50, %v774_v49 }
 0x170   : > { %1195 = vmatprep.mubr.bf16.mxu1 %v808_v52  ;;  %2908 = vmatpush3.bf16.msra.mxu1 %v3116_v3 }
 0x171   : > { %1196 = vmatmul.mubr.bf16.gmra.mrb[60].mxu1 %v807_v51  ;;  %2901 = vmatprep.subr.bf16.mxu1 %v3117_v7 }
 0x174   : > { %2909 = vmatpush3.bf16.msra.mxu1 %v3118_v13 }
 0x175   : > { %2902 = vmatprep.subr.bf16.mxu1 %v3119_v16 }
 0x178   : > { %2910 = vmatpush3.bf16.msra.mxu1 %v3120_v22 }
 0x179   : > { %2903 = vmatprep.subr.bf16.mxu1 %v3121_v25 }
 0x17c   : > { %2911 = vmatpush3.bf16.msra.mxu1 %v3122_v31 }
 0x17d   : > { %2904 = vmatprep.subr.bf16.mxu1 %v3123_v5 }
 0x180   : > { %2912 = vmatpush3.bf16.msra.mxu1 %v3124_v43 }
 0x1cc   : > { %v1047_v55 = vpop.f32.mrb[0].mxu1 }
 0x1cd   : > { %v1048_v56 = vadd.f32 %v1047_v55, %v3797_v54  ;;  %v1049_v57 = vpop.f32.mrb[1].mxu1 }
 0x1ce   : > { %v1050_v59 = vadd.f32 %v1049_v57, %v3800_v41  ;;  %v1051_v60 = vpop.f32.mrb[2].mxu1 }
 0x1cf   : > { %v1052_v61 = vadd.f32 %v1051_v60, %v3797_v54  ;;  %v1053_v62 = vpop.f32.mrb[3].mxu1  ;;  %v1206_v1 = vmax.f32 %v1048_v56, 0.0 }
 0x1d0   : > { %v1054_v0 = vadd.f32 %v1053_v62, %v3800_v41  ;;  %v1207_v4 = vmax.f32 %v1050_v59, 0.0 }
 0x1d1   : > { %v1208_v2 = vmax.f32 %v1052_v61, 0.0 }
 0x1d2   : > { %v1209_v6 = vmax.f32 %v1054_v0, 0.0 }
 0x1d3   : > { %v1270_v8 = vpack.c.bf16 %v1208_v2, %v1206_v1 }
 0x1d4   : > { %v1271_v9 = vpack.c.bf16 %v1209_v6, %v1207_v4  ;;  %v1057_v10 = vpop.f32.mrb[4].mxu1 }
 0x1d5   : > { %v1058_v11 = vadd.f32 %v1057_v10, %v3797_v54  ;;  %v1059_v12 = vpop.f32.mrb[5].mxu1 }
 0x1d6   : > { %v1060_v14 = vadd.f32 %v1059_v12, %v3800_v41  ;;  %v1061_v15 = vpop.f32.mrb[6].mxu1  ;;  %1538 = vmatprep.mubr.bf16.mxu0 %v1271_v9 }
 0x1d7   : > { %v1062_v17 = vadd.f32 %v1061_v15, %v3797_v54  ;;  %v1063_v18 = vpop.f32.mrb[7].mxu1  ;;  %1539 = vmatmul.mubr.bf16.vlgmr.msra.gmra.mrb[64].mxu0 %v1270_v8  ;;  %v1210_v20 = vmax.f32 %v1058_v11, 0.0 }
 0x1d8   : > { %v1064_v19 = vadd.f32 %v1063_v18, %v3800_v41  ;;  %2788 = vmatpush3.bf16.msra.mxu0 %v3114_v58  ;;  %v1211_v23 = vmax.f32 %v1060_v14, 0.0 }
 0x1d9   : > { %v1212_v21 = vmax.f32 %v1062_v17, 0.0  ;;  %2789 = vmatprep.subr.bf16.mxu0 %v3115_v63 }
 0x1da   : > { %v1213_v24 = vmax.f32 %v1064_v19, 0.0 }
 0x1db   : > { %v1272_v26 = vpack.c.bf16 %v1212_v21, %v1210_v20 }
 0x1dc   : > { %v1273_v27 = vpack.c.bf16 %v1213_v24, %v1211_v23  ;;  %v1067_v28 = vpop.f32.mrb[8].mxu1  ;;  %2790 = vmatpush3.bf16.msra.mxu0 %v3116_v3 }
 0x1dd   : > { %v1068_v29 = vadd.f32 %v1067_v28, %v3797_v54  ;;  %v1069_v30 = vpop.f32.mrb[9].mxu1  ;;  %2791 = vmatprep.subr.bf16.mxu0 %v3117_v7 }
 0x1de   : > { %v1070_v32 = vadd.f32 %v1069_v30, %v3800_v41  ;;  %v1071_v33 = vpop.f32.mrb[10].mxu1  ;;  %1548 = vmatprep.mubr.bf16.mxu0 %v1273_v27 }
 0x1df   : > { %v1072_v34 = vadd.f32 %v1071_v33, %v3797_v54  ;;  %v1073_v35 = vpop.f32.mrb[11].mxu1  ;;  %1549 = vmatmul.mubr.bf16.gmra.mrb[68].mxu0 %v1272_v26  ;;  %v1214_v39 = vmax.f32 %v1068_v29, 0.0 }
 0x1e0   : > { %v1074_v37 = vadd.f32 %v1073_v35, %v3800_v41  ;;  %2792 = vmatpush3.bf16.msra.mxu0 %v3118_v13  ;;  %v1215_v44 = vmax.f32 %v1070_v32, 0.0 }
 0x1e1   : > { %v1216_v40 = vmax.f32 %v1072_v34, 0.0  ;;  %2793 = vmatprep.subr.bf16.mxu0 %v3119_v16 }
 0x1e2   : > { %v1217_v45 = vmax.f32 %v1074_v37, 0.0 }
 0x1e3   : > { %v1274_v46 = vpack.c.bf16 %v1216_v40, %v1214_v39 }
 0x1e4   : > { %v1275_v47 = vpack.c.bf16 %v1217_v45, %v1215_v44  ;;  %v1077_v48 = vpop.f32.mrb[12].mxu1  ;;  %2794 = vmatpush3.bf16.msra.mxu0 %v3120_v22 }
 0x1e5   : > { %v1078_v49 = vadd.f32 %v1077_v48, %v3797_v54  ;;  %v1079_v50 = vpop.f32.mrb[13].mxu1  ;;  %2795 = vmatprep.subr.bf16.mxu0 %v3121_v25 }
 0x1e6   : > { %v1080_v51 = vadd.f32 %v1079_v50, %v3800_v41  ;;  %v1081_v52 = vpop.f32.mrb[14].mxu1  ;;  %1558 = vmatprep.mubr.bf16.mxu0 %v1275_v47 }
 0x1e7   : > { %v1082_v53 = vadd.f32 %v1081_v52, %v3797_v54  ;;  %v1083_v55 = vpop.f32.mrb[15].mxu1  ;;  %1559 = vmatmul.mubr.bf16.gmra.mrb[72].mxu0 %v1274_v46  ;;  %v1218_v56 = vmax.f32 %v1078_v49, 0.0 }
 0x1e8   : > { %v1084_v42 = vadd.f32 %v1083_v55, %v3800_v41  ;;  %2796 = vmatpush3.bf16.msra.mxu0 %v3122_v31  ;;  %v1219_v58 = vmax.f32 %v1080_v51, 0.0 }
 0x1e9   : > { %v1220_v57 = vmax.f32 %v1082_v53, 0.0  ;;  %2797 = vmatprep.subr.bf16.mxu0 %v3123_v5 }
 0x1ea   : > { %v1221_v59 = vmax.f32 %v1084_v42, 0.0 }
 0x1eb   : > { %v1276_v60 = vpack.c.bf16 %v1220_v57, %v1218_v56 }
 0x1ec   : > { %v1277_v61 = vpack.c.bf16 %v1221_v59, %v1219_v58  ;;  %v1087_v62 = vpop.f32.mrb[16].mxu1  ;;  %2798 = vmatpush3.bf16.msra.mxu0 %v3124_v43 }
 0x1ed   : > { %v1088_v63 = vadd.f32 %v1087_v62, %v3797_v54  ;;  %v1089_v0 = vpop.f32.mrb[17].mxu1 }
 0x1ee   : > { %v1090_v1 = vadd.f32 %v1089_v0, %v3800_v41  ;;  %v1091_v2 = vpop.f32.mrb[18].mxu1  ;;  %1568 = vmatprep.mubr.bf16.mxu0 %v1277_v61 }
 0x1ef   : > { %v1092_v3 = vadd.f32 %v1091_v2, %v3797_v54  ;;  %v1093_v4 = vpop.f32.mrb[19].mxu1  ;;  %1569 = vmatmul.mubr.bf16.gmra.mrb[76].mxu0 %v1276_v60  ;;  %v1222_v7 = vmax.f32 %v1088_v63, 0.0 }
 0x1f0   : > { %v1094_v6 = vadd.f32 %v1093_v4, %v3800_v41  ;;  %v1223_v9 = vmax.f32 %v1090_v1, 0.0 }
 0x1f1   : > { %v1224_v8 = vmax.f32 %v1092_v3, 0.0 }
 0x1f2   : > { %v1225_v10 = vmax.f32 %v1094_v6, 0.0 }
 0x1f3   : > { %v1278_v11 = vpack.c.bf16 %v1224_v8, %v1222_v7 }
 0x1f4   : > { %v1279_v12 = vpack.c.bf16 %v1225_v10, %v1223_v9  ;;  %v1097_v13 = vpop.f32.mrb[20].mxu1 }
 0x1f5   : > { %v1098_v14 = vadd.f32 %v1097_v13, %v3797_v54  ;;  %v1099_v15 = vpop.f32.mrb[21].mxu1 }
 0x1f6   : > { %v1100_v16 = vadd.f32 %v1099_v15, %v3800_v41  ;;  %v1101_v17 = vpop.f32.mrb[22].mxu1  ;;  %1578 = vmatprep.mubr.bf16.mxu0 %v1279_v12 }
 0x1f7   : > { %v1102_v18 = vadd.f32 %v1101_v17, %v3797_v54  ;;  %v1103_v19 = vpop.f32.mrb[23].mxu1  ;;  %1579 = vmatmul.mubr.bf16.gmra.mrb[80].mxu0 %v1278_v11  ;;  %v1226_v21 = vmax.f32 %v1098_v14, 0.0 }
 0x1f8   : > { %v1104_v20 = vadd.f32 %v1103_v19, %v3800_v41  ;;  %v1227_v23 = vmax.f32 %v1100_v16, 0.0 }
 0x1f9   : > { %v1228_v22 = vmax.f32 %v1102_v18, 0.0 }
 0x1fa   : > { %v1229_v24 = vmax.f32 %v1104_v20, 0.0 }
 0x1fb   : > { %v1280_v25 = vpack.c.bf16 %v1228_v22, %v1226_v21 }
 0x1fc   : > { %v1281_v26 = vpack.c.bf16 %v1229_v24, %v1227_v23  ;;  %v1107_v27 = vpop.f32.mrb[24].mxu1 }
 0x1fd   : > { %v1108_v28 = vadd.f32 %v1107_v27, %v3797_v54  ;;  %v1109_v29 = vpop.f32.mrb[25].mxu1 }
 0x1fe   : > { %v1110_v30 = vadd.f32 %v1109_v29, %v3800_v41  ;;  %v1111_v31 = vpop.f32.mrb[26].mxu1  ;;  %1588 = vmatprep.mubr.bf16.mxu0 %v1281_v26 }
 0x1ff   : > { %v1112_v32 = vadd.f32 %v1111_v31, %v3797_v54  ;;  %v1113_v33 = vpop.f32.mrb[27].mxu1  ;;  %1589 = vmatmul.mubr.bf16.gmra.mrb[84].mxu0 %v1280_v25  ;;  %v1230_v34 = vmax.f32 %v1108_v28, 0.0 }
 0x200   : > { %v1114_v5 = vadd.f32 %v1113_v33, %v3800_v41  ;;  %v1231_v37 = vmax.f32 %v1110_v30, 0.0 }
 0x201   : > { %v1232_v35 = vmax.f32 %v1112_v32, 0.0 }
 0x202   : > { %v1233_v39 = vmax.f32 %v1114_v5, 0.0 }
 0x203   : > { %v1282_v40 = vpack.c.bf16 %v1232_v35, %v1230_v34 }
 0x204   : > { %v1283_v43 = vpack.c.bf16 %v1233_v39, %v1231_v37  ;;  %v1117_v44 = vpop.f32.mrb[28].mxu1 }
 0x205   : > { %v1118_v45 = vadd.f32 %v1117_v44, %v3797_v54  ;;  %v1119_v46 = vpop.f32.mrb[29].mxu1 }
 0x206   : > { %v1120_v47 = vadd.f32 %v1119_v46, %v3800_v41  ;;  %v1121_v48 = vpop.f32.mrb[30].mxu1  ;;  %1598 = vmatprep.mubr.bf16.mxu0 %v1283_v43 }
 0x207   : > { %v1122_v49 = vadd.f32 %v1121_v48, %v3797_v54  ;;  %v1123_v50 = vpop.f32.mrb[31].mxu1  ;;  %1599 = vmatmul.mubr.bf16.gmra.mrb[88].mxu0 %v1282_v40  ;;  %v1234_v52 = vmax.f32 %v1118_v45, 0.0 }
 0x208   : > { %v1124_v51 = vadd.f32 %v1123_v50, %v3800_v41  ;;  %v1235_v55 = vmax.f32 %v1120_v47, 0.0 }
 0x209   : > { %v1236_v53 = vmax.f32 %v1122_v49, 0.0 }
 0x20a   : > { %v1237_v42 = vmax.f32 %v1124_v51, 0.0 }
 0x20b   : > { %v1284_v56 = vpack.c.bf16 %v1236_v53, %v1234_v52  ;;  %v3125_v53 = vld [vmem:[%s4237_s7 + $0x70] sm:$0xff]  }
 0x20c   : > { %v1285_v57 = vpack.c.bf16 %v1237_v42, %v1235_v55  ;;  %v1127_v58 = vpop.f32.mrb[32].mxu1  ;;  %2905 = vmatprep.subr.bf16.mxu1 %v3125_v53  ;;  %2799 = vmatprep.subr.bf16.mxu0 %v3125_v53 }
 0x20d   : > { %v1128_v59 = vadd.f32 %v1127_v58, %v3797_v54  ;;  %v1129_v60 = vpop.f32.mrb[33].mxu1 }
 0x20e   : > { %v1130_v61 = vadd.f32 %v1129_v60, %v3800_v41  ;;  %v1131_v62 = vpop.f32.mrb[34].mxu1  ;;  %1608 = vmatprep.mubr.bf16.mxu0 %v1285_v57 }
 0x20f   : > { %v1132_v63 = vadd.f32 %v1131_v62, %v3797_v54  ;;  %v1133_v0 = vpop.f32.mrb[35].mxu1  ;;  %1609 = vmatmul.mubr.bf16.gmra.mrb[92].mxu0 %v1284_v56  ;;  %v1238_v2 = vmax.f32 %v1128_v59, 0.0  ;;  %v3126_v56 = vld [vmem:[%s4237_s7 + $0x30] sm:$0xff]  }
 0x210   : > { %v1134_v1 = vadd.f32 %v1133_v0, %v3800_v41  ;;  %v1239_v4 = vmax.f32 %v1130_v61, 0.0  ;;  %2913 = vmatpush3.bf16.msra.mxu1 %v3126_v56  ;;  %2800 = vmatpush3.bf16.msra.mxu0 %v3126_v56 }
 0x211   : > { %v1240_v3 = vmax.f32 %v1132_v63, 0.0  ;;  %v3127_v63 = vld [vmem:[%s4237_s7 + $0x78] sm:$0xff]  }
 0x212   : > { %v1241_v6 = vmax.f32 %v1134_v1, 0.0  ;;  %v3128_v1 = vld [vmem:[%s4237_s7 + $0x38] sm:$0xff]   ;;  %2801 = vmatprep.subr.bf16.mxu0 %v3127_v63  ;;  %2906 = vmatprep.subr.bf16.mxu1 %v3127_v63 }
 0x213   : > { %v1286_v7 = vpack.c.bf16 %v1240_v3, %v1238_v2 }
 0x214   : > { %v1287_v8 = vpack.c.bf16 %v1241_v6, %v1239_v4  ;;  %v1137_v9 = vpop.f32.mrb[36].mxu1  ;;  %2914 = vmatpush3.bf16.msra.mxu1 %v3128_v1  ;;  %2802 = vmatpush3.bf16.msra.mxu0 %v3128_v1 }
 0x215   : > { %v1138_v10 = vadd.f32 %v1137_v9, %v3797_v54  ;;  %v1139_v11 = vpop.f32.mrb[37].mxu1 }
 0x216   : > { %v1140_v12 = vadd.f32 %v1139_v11, %v3800_v41  ;;  %v1141_v13 = vpop.f32.mrb[38].mxu1  ;;  %1618 = vmatprep.mubr.bf16.mxu0 %v1287_v8 }
 0x217   : > { %v1142_v14 = vadd.f32 %v1141_v13, %v3797_v54  ;;  %v1143_v15 = vpop.f32.mrb[39].mxu1  ;;  %1619 = vmatmul.mubr.bf16.gmra.mrb[96].mxu0 %v1286_v7  ;;  %v1242_v17 = vmax.f32 %v1138_v10, 0.0 }
 0x218   : > { %v1144_v16 = vadd.f32 %v1143_v15, %v3800_v41  ;;  %v1243_v19 = vmax.f32 %v1140_v12, 0.0 }
 0x219   : > { %v1244_v18 = vmax.f32 %v1142_v14, 0.0 }
 0x21a   : > { %v1245_v20 = vmax.f32 %v1144_v16, 0.0 }
 0x21b   : > { %v1288_v21 = vpack.c.bf16 %v1244_v18, %v1242_v17 }
 0x21c   : > { %v1289_v22 = vpack.c.bf16 %v1245_v20, %v1243_v19  ;;  %v1147_v23 = vpop.f32.mrb[40].mxu1 }
 0x21d   : > { %v1148_v24 = vadd.f32 %v1147_v23, %v3797_v54  ;;  %v1149_v25 = vpop.f32.mrb[41].mxu1 }
 0x21e   : > { %v1150_v26 = vadd.f32 %v1149_v25, %v3800_v41  ;;  %v1151_v27 = vpop.f32.mrb[42].mxu1  ;;  %1628 = vmatprep.mubr.bf16.mxu0 %v1289_v22 }
 0x21f   : > { %v1152_v28 = vadd.f32 %v1151_v27, %v3797_v54  ;;  %v1153_v29 = vpop.f32.mrb[43].mxu1  ;;  %1629 = vmatmul.mubr.bf16.gmra.mrb[100].mxu0 %v1288_v21  ;;  %v1246_v31 = vmax.f32 %v1148_v24, 0.0 }
 0x220   : > { %v1154_v30 = vadd.f32 %v1153_v29, %v3800_v41  ;;  %v1247_v33 = vmax.f32 %v1150_v26, 0.0 }
 0x221   : > { %v1248_v32 = vmax.f32 %v1152_v28, 0.0 }
 0x222   : > { %v1249_v5 = vmax.f32 %v1154_v30, 0.0 }
 0x223   : > { %v1290_v34 = vpack.c.bf16 %v1248_v32, %v1246_v31 }
 0x224   : > { %v1291_v35 = vpack.c.bf16 %v1249_v5, %v1247_v33  ;;  %v1157_v37 = vpop.f32.mrb[44].mxu1 }
 0x225   : > { %v1158_v39 = vadd.f32 %v1157_v37, %v3797_v54  ;;  %v1159_v40 = vpop.f32.mrb[45].mxu1 }
 0x226   : > { %v1160_v43 = vadd.f32 %v1159_v40, %v3800_v41  ;;  %v1161_v44 = vpop.f32.mrb[46].mxu1  ;;  %1638 = vmatprep.mubr.bf16.mxu0 %v1291_v35 }
 0x227   : > { %v1162_v45 = vadd.f32 %v1161_v44, %v3797_v54  ;;  %v1163_v46 = vpop.f32.mrb[47].mxu1  ;;  %1639 = vmatmul.mubr.bf16.gmra.mrb[104].mxu0 %v1290_v34  ;;  %v1250_v48 = vmax.f32 %v1158_v39, 0.0 }
 0x228   : > { %v1164_v47 = vadd.f32 %v1163_v46, %v3800_v41  ;;  %v1251_v50 = vmax.f32 %v1160_v43, 0.0 }
 0x229   : > { %v1252_v49 = vmax.f32 %v1162_v45, 0.0 }
 0x22a   : > { %v1253_v51 = vmax.f32 %v1164_v47, 0.0 }
 0x22b   : > { %v1292_v52 = vpack.c.bf16 %v1252_v49, %v1250_v48 }
 0x22c   : > { %v1293_v55 = vpack.c.bf16 %v1253_v51, %v1251_v50  ;;  %v1167_v42 = vpop.f32.mrb[48].mxu1 }
 0x22d   : > { %v1168_v57 = vadd.f32 %v1167_v42, %v3797_v54  ;;  %v1169_v58 = vpop.f32.mrb[49].mxu1 }
 0x22e   : > { %v1170_v59 = vadd.f32 %v1169_v58, %v3800_v41  ;;  %v1171_v60 = vpop.f32.mrb[50].mxu1  ;;  %1648 = vmatprep.mubr.bf16.mxu0 %v1293_v55  ;;  %v1334_v55 = vld [vmem:[%s4236_s6] sm:$0x3] }
 0x22f   : > { %v1172_v61 = vadd.f32 %v1171_v60, %v3797_v54  ;;  %v1173_v62 = vpop.f32.mrb[51].mxu1  ;;  %1649 = vmatmul.mubr.bf16.gmra.mrb[108].mxu0 %v1292_v52  ;;  %v1254_v2 = vmax.f32 %v1168_v57, 0.0  ;;  %v3918_v42 = vrot.slane %v1334_v55, %v3632_v36 }
 0x230   : > { %v1174_v0 = vadd.f32 %v1173_v62, %v3800_v41  ;;  %v1255_v4 = vmax.f32 %v1170_v59, 0.0 }
 0x231   : > { %v1256_v3 = vmax.f32 %v1172_v61, 0.0 }
 0x232   : > { %v1257_v6 = vmax.f32 %v1174_v0, 0.0 }
 0x233   : > { %v1294_v7 = vpack.c.bf16 %v1256_v3, %v1254_v2 }
 0x234   : > { %v1295_v8 = vpack.c.bf16 %v1257_v6, %v1255_v4  ;;  %v1177_v9 = vpop.f32.mrb[52].mxu1 }
 0x235   : > { %v1178_v10 = vadd.f32 %v1177_v9, %v3797_v54  ;;  %v1179_v11 = vpop.f32.mrb[53].mxu1 }
 0x236   : > { %v1180_v12 = vadd.f32 %v1179_v11, %v3800_v41  ;;  %v1181_v13 = vpop.f32.mrb[54].mxu1  ;;  %1658 = vmatprep.mubr.bf16.mxu0 %v1295_v8 }
 0x237   : > { %v1182_v14 = vadd.f32 %v1181_v13, %v3797_v54  ;;  %v1183_v15 = vpop.f32.mrb[55].mxu1  ;;  %1659 = vmatmul.mubr.bf16.gmra.mrb[112].mxu0 %v1294_v7  ;;  %v1258_v17 = vmax.f32 %v1178_v10, 0.0 }
 0x238   : > { %v1184_v16 = vadd.f32 %v1183_v15, %v3800_v41  ;;  %v1259_v19 = vmax.f32 %v1180_v12, 0.0 }
 0x239   : > { %v1260_v18 = vmax.f32 %v1182_v14, 0.0 }
 0x23a   : > { %v1261_v20 = vmax.f32 %v1184_v16, 0.0 }
 0x23b   : > { %v1296_v21 = vpack.c.bf16 %v1260_v18, %v1258_v17 }
 0x23c   : > { %v1297_v22 = vpack.c.bf16 %v1261_v20, %v1259_v19  ;;  %v1187_v23 = vpop.f32.mrb[56].mxu1 }
 0x23d   : > { %v1188_v24 = vadd.f32 %v1187_v23, %v3797_v54  ;;  %v1189_v25 = vpop.f32.mrb[57].mxu1 }
 0x23e   : > { %v1190_v26 = vadd.f32 %v1189_v25, %v3800_v41  ;;  %v1191_v27 = vpop.f32.mrb[58].mxu1  ;;  %1668 = vmatprep.mubr.bf16.mxu0 %v1297_v22 }
 0x23f   : > { %v1192_v28 = vadd.f32 %v1191_v27, %v3797_v54  ;;  %v1193_v29 = vpop.f32.mrb[59].mxu1  ;;  %1669 = vmatmul.mubr.bf16.gmra.mrb[116].mxu0 %v1296_v21  ;;  %v1262_v31 = vmax.f32 %v1188_v24, 0.0 }
 0x240   : > { %v1194_v30 = vadd.f32 %v1193_v29, %v3800_v41  ;;  %v1263_v33 = vmax.f32 %v1190_v26, 0.0 }
 0x241   : > { %v1264_v32 = vmax.f32 %v1192_v28, 0.0 }
 0x242   : > { %v1265_v5 = vmax.f32 %v1194_v30, 0.0 }
 0x243   : > { %v1298_v34 = vpack.c.bf16 %v1264_v32, %v1262_v31 }
 0x244   : > { %v1299_v35 = vpack.c.bf16 %v1265_v5, %v1263_v33  ;;  %v1197_v37 = vpop.f32.mrb[60].mxu1 }
 0x245   : > { %v1198_v39 = vadd.f32 %v1197_v37, %v3797_v54  ;;  %v1199_v40 = vpop.f32.mrb[61].mxu1 }
 0x246   : > { %v1200_v43 = vadd.f32 %v1199_v40, %v3800_v41  ;;  %v1201_v44 = vpop.f32.mrb[62].mxu1  ;;  %1678 = vmatprep.mubr.bf16.mxu0 %v1299_v35 }
 0x247   : > { %v1202_v45 = vadd.f32 %v1201_v44, %v3797_v54  ;;  %v1203_v46 = vpop.f32.mrb[63].mxu1  ;;  %1679 = vmatmul.mubr.bf16.gmra.mrb[120].mxu0 %v1298_v34  ;;  %v1266_v48 = vmax.f32 %v1198_v39, 0.0  ;;  %v3921_v54 = vrot.slane %v1334_v55, %v3637_v38 }
 0x248   : > { %v1204_v47 = vadd.f32 %v1203_v46, %v3800_v41  ;;  %v1267_v50 = vmax.f32 %v1200_v43, 0.0 }
 0x249   : > { %v1268_v49 = vmax.f32 %v1202_v45, 0.0 }
 0x24a   : > { %v1269_v51 = vmax.f32 %v1204_v47, 0.0 }
 0x24b   : > { %v1300_v52 = vpack.c.bf16 %v1268_v49, %v1266_v48 }
 0x24c   : > { %v1301_v53 = vpack.c.bf16 %v1269_v51, %v1267_v50 }
 0x24e   : > { %1688 = vmatprep.mubr.bf16.mxu0 %v1301_v53 }
 0x24f   : > { %1689 = vmatmul.mubr.bf16.gmra.mrb[124].mxu0 %v1300_v52 }
 0x2aa   : > { %v1540_v56 = vpop.f32.mrb[64].mxu0 }
 0x2ab   : > { %v1541_v41 = vadd.f32 %v1540_v56, %v3918_v42  ;;  %v1542_v57 = vpop.f32.mrb[65].mxu0 }
 0x2ac   : > { %v1543_v58 = vadd.f32 %v1542_v57, %v3921_v54  ;;  %v1544_v59 = vpop.f32.mrb[66].mxu0 }
 0x2ad   : > { %v1545_v60 = vadd.f32 %v1544_v59, %v3918_v42  ;;  %v1546_v61 = vpop.f32.mrb[67].mxu0  ;;  %v1699_v63 = vmax.f32 %v1541_v41, 0.0 }
 0x2ae   : > { %v1547_v62 = vadd.f32 %v1546_v61, %v3921_v54  ;;  %v1700_v1 = vmax.f32 %v1543_v58, 0.0 }
 0x2af   : > { %v1701_v0 = vmax.f32 %v1545_v60, 0.0 }
 0x2b0   : > { %v1702_v36 = vmax.f32 %v1547_v62, 0.0 }
 0x2b1   : > { %v1763_v2 = vpack.c.bf16 %v1701_v0, %v1699_v63 }
 0x2b2   : > { %v1764_v3 = vpack.c.bf16 %v1702_v36, %v1700_v1  ;;  %v1550_v38 = vpop.f32.mrb[68].mxu0 }
 0x2b3   : > { %v1551_v4 = vadd.f32 %v1550_v38, %v3918_v42  ;;  %v1552_v6 = vpop.f32.mrb[69].mxu0 }
 0x2b4   : > { %v1553_v7 = vadd.f32 %v1552_v6, %v3921_v54  ;;  %v1554_v8 = vpop.f32.mrb[70].mxu0  ;;  %1962 = vmatprep.mubr.bf16.mxu0 %v1764_v3 }
 0x2b5   : > { %v1555_v9 = vadd.f32 %v1554_v8, %v3918_v42  ;;  %v1556_v10 = vpop.f32.mrb[71].mxu0  ;;  %1963 = vmatmul.mubr.bf16.vlgmr.msra.gmra.mrb[128].mxu0 %v1763_v2  ;;  %v1703_v12 = vmax.f32 %v1551_v4, 0.0 }
 0x2b6   : > { %v1557_v11 = vadd.f32 %v1556_v10, %v3921_v54  ;;  %v1704_v14 = vmax.f32 %v1553_v7, 0.0 }
 0x2b7   : > { %v1705_v13 = vmax.f32 %v1555_v9, 0.0 }
 0x2b8   : > { %v1706_v15 = vmax.f32 %v1557_v11, 0.0 }
 0x2b9   : > { %v1765_v16 = vpack.c.bf16 %v1705_v13, %v1703_v12 }
 0x2ba   : > { %v1766_v17 = vpack.c.bf16 %v1706_v15, %v1704_v14  ;;  %v1560_v18 = vpop.f32.mrb[72].mxu0 }
 0x2bb   : > { %v1561_v19 = vadd.f32 %v1560_v18, %v3918_v42  ;;  %v1562_v20 = vpop.f32.mrb[73].mxu0 }
 0x2bc   : > { %v1563_v21 = vadd.f32 %v1562_v20, %v3921_v54  ;;  %v1564_v22 = vpop.f32.mrb[74].mxu0  ;;  %1970 = vmatprep.mubr.bf16.mxu0 %v1766_v17 }
 0x2bd   : > { %v1565_v23 = vadd.f32 %v1564_v22, %v3918_v42  ;;  %v1566_v24 = vpop.f32.mrb[75].mxu0  ;;  %1971 = vmatmul.mubr.bf16.gmra.mrb[132].mxu0 %v1765_v16  ;;  %v1707_v26 = vmax.f32 %v1561_v19, 0.0 }
 0x2be   : > { %v1567_v25 = vadd.f32 %v1566_v24, %v3921_v54  ;;  %v1708_v28 = vmax.f32 %v1563_v21, 0.0 }
 0x2bf   : > { %v1709_v27 = vmax.f32 %v1565_v23, 0.0 }
 0x2c0   : > { %v1710_v29 = vmax.f32 %v1567_v25, 0.0 }
 0x2c1   : > { %v1767_v30 = vpack.c.bf16 %v1709_v27, %v1707_v26 }
 0x2c2   : > { %v1768_v31 = vpack.c.bf16 %v1710_v29, %v1708_v28  ;;  %v1570_v32 = vpop.f32.mrb[76].mxu0 }
 0x2c3   : > { %v1571_v33 = vadd.f32 %v1570_v32, %v3918_v42  ;;  %v1572_v5 = vpop.f32.mrb[77].mxu0 }
 0x2c4   : > { %v1573_v34 = vadd.f32 %v1572_v5, %v3921_v54  ;;  %v1574_v35 = vpop.f32.mrb[78].mxu0  ;;  %1978 = vmatprep.mubr.bf16.mxu0 %v1768_v31 }
 0x2c5   : > { %v1575_v37 = vadd.f32 %v1574_v35, %v3918_v42  ;;  %v1576_v39 = vpop.f32.mrb[79].mxu0  ;;  %1979 = vmatmul.mubr.bf16.gmra.mrb[136].mxu0 %v1767_v30  ;;  %v1711_v43 = vmax.f32 %v1571_v33, 0.0 }
 0x2c6   : > { %v1577_v40 = vadd.f32 %v1576_v39, %v3921_v54  ;;  %v1712_v45 = vmax.f32 %v1573_v34, 0.0 }
 0x2c7   : > { %v1713_v44 = vmax.f32 %v1575_v37, 0.0 }
 0x2c8   : > { %v1714_v46 = vmax.f32 %v1577_v40, 0.0 }
 0x2c9   : > { %v1769_v47 = vpack.c.bf16 %v1713_v44, %v1711_v43 }
 0x2ca   : > { %v1770_v48 = vpack.c.bf16 %v1714_v46, %v1712_v45  ;;  %v1580_v49 = vpop.f32.mrb[80].mxu0 }
 0x2cb   : > { %v1581_v50 = vadd.f32 %v1580_v49, %v3918_v42  ;;  %v1582_v51 = vpop.f32.mrb[81].mxu0 }
 0x2cc   : > { %v1583_v52 = vadd.f32 %v1582_v51, %v3921_v54  ;;  %v1584_v53 = vpop.f32.mrb[82].mxu0  ;;  %1986 = vmatprep.mubr.bf16.mxu1 %v1770_v48 }
 0x2cd   : > { %v1585_v55 = vadd.f32 %v1584_v53, %v3918_v42  ;;  %v1586_v56 = vpop.f32.mrb[83].mxu0  ;;  %1987 = vmatmul.mubr.bf16.vlgmr.msra.gmra.mrb[64].mxu1 %v1769_v47  ;;  %v1715_v57 = vmax.f32 %v1581_v50, 0.0 }
 0x2ce   : > { %v1587_v41 = vadd.f32 %v1586_v56, %v3921_v54  ;;  %v1716_v59 = vmax.f32 %v1583_v52, 0.0 }
 0x2cf   : > { %v1717_v58 = vmax.f32 %v1585_v55, 0.0 }
 0x2d0   : > { %v1718_v60 = vmax.f32 %v1587_v41, 0.0 }
 0x2d1   : > { %v1771_v61 = vpack.c.bf16 %v1717_v58, %v1715_v57 }
 0x2d2   : > { %v1772_v62 = vpack.c.bf16 %v1718_v60, %v1716_v59  ;;  %v1590_v63 = vpop.f32.mrb[84].mxu0 }
 0x2d3   : > { %v1591_v0 = vadd.f32 %v1590_v63, %v3918_v42  ;;  %v1592_v1 = vpop.f32.mrb[85].mxu0 }
 0x2d4   : > { %v1593_v36 = vadd.f32 %v1592_v1, %v3921_v54  ;;  %v1594_v2 = vpop.f32.mrb[86].mxu0  ;;  %1994 = vmatprep.mubr.bf16.mxu1 %v1772_v62 }
 0x2d5   : > { %v1595_v3 = vadd.f32 %v1594_v2, %v3918_v42  ;;  %v1596_v38 = vpop.f32.mrb[87].mxu0  ;;  %1995 = vmatmul.mubr.bf16.gmra.mrb[68].mxu1 %v1771_v61  ;;  %v1719_v6 = vmax.f32 %v1591_v0, 0.0 }
 0x2d6   : > { %v1597_v4 = vadd.f32 %v1596_v38, %v3921_v54  ;;  %v1720_v8 = vmax.f32 %v1593_v36, 0.0 }
 0x2d7   : > { %v1721_v7 = vmax.f32 %v1595_v3, 0.0 }
 0x2d8   : > { %v1722_v9 = vmax.f32 %v1597_v4, 0.0 }
 0x2d9   : > { %v1773_v10 = vpack.c.bf16 %v1721_v7, %v1719_v6 }
 0x2da   : > { %v1774_v11 = vpack.c.bf16 %v1722_v9, %v1720_v8  ;;  %v1600_v12 = vpop.f32.mrb[88].mxu0 }
 0x2db   : > { %v1601_v13 = vadd.f32 %v1600_v12, %v3918_v42  ;;  %v1602_v14 = vpop.f32.mrb[89].mxu0 }
 0x2dc   : > { %v1603_v15 = vadd.f32 %v1602_v14, %v3921_v54  ;;  %v1604_v16 = vpop.f32.mrb[90].mxu0  ;;  %2002 = vmatprep.mubr.bf16.mxu1 %v1774_v11 }
 0x2dd   : > { %v1605_v17 = vadd.f32 %v1604_v16, %v3918_v42  ;;  %v1606_v18 = vpop.f32.mrb[91].mxu0  ;;  %2003 = vmatmul.mubr.bf16.gmra.mrb[72].mxu1 %v1773_v10  ;;  %v1723_v20 = vmax.f32 %v1601_v13, 0.0 }
 0x2de   : > { %v1607_v19 = vadd.f32 %v1606_v18, %v3921_v54  ;;  %v1724_v22 = vmax.f32 %v1603_v15, 0.0 }
 0x2df   : > { %v1725_v21 = vmax.f32 %v1605_v17, 0.0 }
 0x2e0   : > { %v1726_v23 = vmax.f32 %v1607_v19, 0.0 }
 0x2e1   : > { %v1775_v24 = vpack.c.bf16 %v1725_v21, %v1723_v20 }
 0x2e2   : > { %v1776_v25 = vpack.c.bf16 %v1726_v23, %v1724_v22  ;;  %v1610_v26 = vpop.f32.mrb[92].mxu0 }
 0x2e3   : > { %v1611_v27 = vadd.f32 %v1610_v26, %v3918_v42  ;;  %v1612_v28 = vpop.f32.mrb[93].mxu0 }
 0x2e4   : > { %v1613_v29 = vadd.f32 %v1612_v28, %v3921_v54  ;;  %v1614_v30 = vpop.f32.mrb[94].mxu0  ;;  %2010 = vmatprep.mubr.bf16.mxu1 %v1776_v25 }
 0x2e5   : > { %v1615_v31 = vadd.f32 %v1614_v30, %v3918_v42  ;;  %v1616_v32 = vpop.f32.mrb[95].mxu0  ;;  %2011 = vmatmul.mubr.bf16.gmra.mrb[76].mxu1 %v1775_v24  ;;  %v1727_v5 = vmax.f32 %v1611_v27, 0.0 }
 0x2e6   : > { %v1617_v33 = vadd.f32 %v1616_v32, %v3921_v54  ;;  %v1728_v35 = vmax.f32 %v1613_v29, 0.0 }
 0x2e7   : > { %v1729_v34 = vmax.f32 %v1615_v31, 0.0 }
 0x2e8   : > { %v1730_v37 = vmax.f32 %v1617_v33, 0.0 }
 0x2e9   : > { %v1777_v39 = vpack.c.bf16 %v1729_v34, %v1727_v5 }
 0x2ea   : > { %v1778_v40 = vpack.c.bf16 %v1730_v37, %v1728_v35  ;;  %v1620_v43 = vpop.f32.mrb[96].mxu0 }
 0x2eb   : > { %v1621_v44 = vadd.f32 %v1620_v43, %v3918_v42  ;;  %v1622_v45 = vpop.f32.mrb[97].mxu0 }
 0x2ec   : > { %v1623_v46 = vadd.f32 %v1622_v45, %v3921_v54  ;;  %v1624_v47 = vpop.f32.mrb[98].mxu0  ;;  %2018 = vmatprep.mubr.bf16.mxu1 %v1778_v40 }
 0x2ed   : > { %v1625_v48 = vadd.f32 %v1624_v47, %v3918_v42  ;;  %v1626_v49 = vpop.f32.mrb[99].mxu0  ;;  %2019 = vmatmul.mubr.bf16.gmra.mrb[80].mxu1 %v1777_v39  ;;  %v1731_v51 = vmax.f32 %v1621_v44, 0.0 }
 0x2ee   : > { %v1627_v50 = vadd.f32 %v1626_v49, %v3921_v54  ;;  %v1732_v53 = vmax.f32 %v1623_v46, 0.0 }
 0x2ef   : > { %v1733_v52 = vmax.f32 %v1625_v48, 0.0 }
 0x2f0   : > { %v1734_v55 = vmax.f32 %v1627_v50, 0.0 }
 0x2f1   : > { %v1779_v56 = vpack.c.bf16 %v1733_v52, %v1731_v51 }
 0x2f2   : > { %v1780_v41 = vpack.c.bf16 %v1734_v55, %v1732_v53  ;;  %v1630_v57 = vpop.f32.mrb[100].mxu0 }
 0x2f3   : > { %v1631_v58 = vadd.f32 %v1630_v57, %v3918_v42  ;;  %v1632_v59 = vpop.f32.mrb[101].mxu0 }
 0x2f4   : > { %v1633_v60 = vadd.f32 %v1632_v59, %v3921_v54  ;;  %v1634_v61 = vpop.f32.mrb[102].mxu0  ;;  %2026 = vmatprep.mubr.bf16.mxu1 %v1780_v41 }
 0x2f5   : > { %v1635_v62 = vadd.f32 %v1634_v61, %v3918_v42  ;;  %v1636_v63 = vpop.f32.mrb[103].mxu0  ;;  %2027 = vmatmul.mubr.bf16.gmra.mrb[84].mxu1 %v1779_v56  ;;  %v1735_v1 = vmax.f32 %v1631_v58, 0.0 }
 0x2f6   : > { %v1637_v0 = vadd.f32 %v1636_v63, %v3921_v54  ;;  %v1736_v2 = vmax.f32 %v1633_v60, 0.0 }
 0x2f7   : > { %v1737_v36 = vmax.f32 %v1635_v62, 0.0 }
 0x2f8   : > { %v1738_v3 = vmax.f32 %v1637_v0, 0.0 }
 0x2f9   : > { %v1781_v38 = vpack.c.bf16 %v1737_v36, %v1735_v1 }
 0x2fa   : > { %v1782_v4 = vpack.c.bf16 %v1738_v3, %v1736_v2  ;;  %v1640_v6 = vpop.f32.mrb[104].mxu0 }
 0x2fb   : > { %v1641_v7 = vadd.f32 %v1640_v6, %v3918_v42  ;;  %v1642_v8 = vpop.f32.mrb[105].mxu0 }
 0x2fc   : > { %v1643_v9 = vadd.f32 %v1642_v8, %v3921_v54  ;;  %v1644_v10 = vpop.f32.mrb[106].mxu0  ;;  %2034 = vmatprep.mubr.bf16.mxu1 %v1782_v4 }
 0x2fd   : > { %v1645_v11 = vadd.f32 %v1644_v10, %v3918_v42  ;;  %v1646_v12 = vpop.f32.mrb[107].mxu0  ;;  %2035 = vmatmul.mubr.bf16.gmra.mrb[88].mxu1 %v1781_v38  ;;  %v1739_v14 = vmax.f32 %v1641_v7, 0.0 }
 0x2fe   : > { %v1647_v13 = vadd.f32 %v1646_v12, %v3921_v54  ;;  %v1740_v16 = vmax.f32 %v1643_v9, 0.0 }
 0x2ff   : > { %v1741_v15 = vmax.f32 %v1645_v11, 0.0 }
 0x300   : > { %v1742_v17 = vmax.f32 %v1647_v13, 0.0 }
 0x301   : > { %v1783_v18 = vpack.c.bf16 %v1741_v15, %v1739_v14 }
 0x302   : > { %v1784_v19 = vpack.c.bf16 %v1742_v17, %v1740_v16  ;;  %v1650_v20 = vpop.f32.mrb[108].mxu0 }
 0x303   : > { %v1651_v21 = vadd.f32 %v1650_v20, %v3918_v42  ;;  %v1652_v22 = vpop.f32.mrb[109].mxu0 }
 0x304   : > { %v1653_v23 = vadd.f32 %v1652_v22, %v3921_v54  ;;  %v1654_v24 = vpop.f32.mrb[110].mxu0  ;;  %2042 = vmatprep.mubr.bf16.mxu1 %v1784_v19 }
 0x305   : > { %v1655_v25 = vadd.f32 %v1654_v24, %v3918_v42  ;;  %v1656_v26 = vpop.f32.mrb[111].mxu0  ;;  %2043 = vmatmul.mubr.bf16.gmra.mrb[92].mxu1 %v1783_v18  ;;  %v1743_v28 = vmax.f32 %v1651_v21, 0.0 }
 0x306   : > { %v1657_v27 = vadd.f32 %v1656_v26, %v3921_v54  ;;  %v1744_v30 = vmax.f32 %v1653_v23, 0.0 }
 0x307   : > { %v1745_v29 = vmax.f32 %v1655_v25, 0.0 }
 0x308   : > { %v1746_v31 = vmax.f32 %v1657_v27, 0.0 }
 0x309   : > { %v1785_v32 = vpack.c.bf16 %v1745_v29, %v1743_v28  ;;  %v3990_v29 = vld [vmem:[%s4238_s8] ss:$0 sm:$0xff] }
 0x30a   : > { %v1786_v33 = vpack.c.bf16 %v1746_v31, %v1744_v30  ;;  %v1660_v5 = vpop.f32.mrb[112].mxu0 }
 0x30b   : > { %v1661_v34 = vadd.f32 %v1660_v5, %v3918_v42  ;;  %v1662_v35 = vpop.f32.mrb[113].mxu0 }
 0x30c   : > { %v1663_v37 = vadd.f32 %v1662_v35, %v3921_v54  ;;  %v1664_v39 = vpop.f32.mrb[114].mxu0  ;;  %2050 = vmatprep.mubr.bf16.mxu1 %v1786_v33 }
 0x30d   : > { %v1665_v40 = vadd.f32 %v1664_v39, %v3918_v42  ;;  %v1666_v43 = vpop.f32.mrb[115].mxu0  ;;  %2051 = vmatmul.mubr.bf16.gmra.mrb[96].mxu1 %v1785_v32  ;;  %v1747_v45 = vmax.f32 %v1661_v34, 0.0 }
 0x30e   : > { %v1667_v44 = vadd.f32 %v1666_v43, %v3921_v54  ;;  %v1748_v47 = vmax.f32 %v1663_v37, 0.0 }
 0x30f   : > { %v1749_v46 = vmax.f32 %v1665_v40, 0.0 }
 0x310   : > { %v1750_v48 = vmax.f32 %v1667_v44, 0.0 }
 0x311   : > { %v1787_v49 = vpack.c.bf16 %v1749_v46, %v1747_v45 }
 0x312   : > { %v1788_v50 = vpack.c.bf16 %v1750_v48, %v1748_v47  ;;  %v1670_v51 = vpop.f32.mrb[116].mxu0 }
 0x313   : > { %v1671_v52 = vadd.f32 %v1670_v51, %v3918_v42  ;;  %v1672_v53 = vpop.f32.mrb[117].mxu0 }
 0x314   : > { %v1673_v55 = vadd.f32 %v1672_v53, %v3921_v54  ;;  %v1674_v56 = vpop.f32.mrb[118].mxu0  ;;  %2058 = vmatprep.mubr.bf16.mxu1 %v1788_v50 }
 0x315   : > { %v1675_v41 = vadd.f32 %v1674_v56, %v3918_v42  ;;  %v1676_v57 = vpop.f32.mrb[119].mxu0  ;;  %2059 = vmatmul.mubr.bf16.gmra.mrb[100].mxu1 %v1787_v49  ;;  %v1751_v59 = vmax.f32 %v1671_v52, 0.0 }
 0x316   : > { %v1677_v58 = vadd.f32 %v1676_v57, %v3921_v54  ;;  %v1752_v61 = vmax.f32 %v1673_v55, 0.0 }
 0x317   : > { %v1753_v60 = vmax.f32 %v1675_v41, 0.0 }
 0x318   : > { %v1754_v62 = vmax.f32 %v1677_v58, 0.0 }
 0x319   : > { %v1789_v63 = vpack.c.bf16 %v1753_v60, %v1751_v59 }
 0x31a   : > { %v1790_v0 = vpack.c.bf16 %v1754_v62, %v1752_v61  ;;  %v1680_v1 = vpop.f32.mrb[120].mxu0 }
 0x31b   : > { %v1681_v36 = vadd.f32 %v1680_v1, %v3918_v42  ;;  %v1682_v2 = vpop.f32.mrb[121].mxu0 }
 0x31c   : > { %v1683_v3 = vadd.f32 %v1682_v2, %v3921_v54  ;;  %v1684_v38 = vpop.f32.mrb[122].mxu0  ;;  %2066 = vmatprep.mubr.bf16.mxu1 %v1790_v0 }
 0x31d   : > { %v1685_v4 = vadd.f32 %v1684_v38, %v3918_v42  ;;  %v1686_v6 = vpop.f32.mrb[123].mxu0  ;;  %2067 = vmatmul.mubr.bf16.gmra.mrb[104].mxu1 %v1789_v63  ;;  %v1755_v8 = vmax.f32 %v1681_v36, 0.0 }
 0x31e   : > { %v1687_v7 = vadd.f32 %v1686_v6, %v3921_v54  ;;  %v1756_v10 = vmax.f32 %v1683_v3, 0.0 }
 0x31f   : > { %v1757_v9 = vmax.f32 %v1685_v4, 0.0 }
 0x320   : > { %v1758_v11 = vmax.f32 %v1687_v7, 0.0 }
 0x321   : > { %v1791_v12 = vpack.c.bf16 %v1757_v9, %v1755_v8 }
 0x322   : > { %v1792_v13 = vpack.c.bf16 %v1758_v11, %v1756_v10  ;;  %v1690_v14 = vpop.f32.mrb[124].mxu0 }
 0x323   : > { %v1691_v15 = vadd.f32 %v1690_v14, %v3918_v42  ;;  %v1692_v16 = vpop.f32.mrb[125].mxu0 }
 0x324   : > { %v1693_v17 = vadd.f32 %v1692_v16, %v3921_v54  ;;  %v1694_v18 = vpop.f32.mrb[126].mxu0  ;;  %2074 = vmatprep.mubr.bf16.mxu1 %v1792_v13 }
 0x325   : > { %v1695_v19 = vadd.f32 %v1694_v18, %v3918_v42  ;;  %v1696_v20 = vpop.f32.mrb[127].mxu0  ;;  %2075 = vmatmul.mubr.bf16.gmra.mrb[108].mxu1 %v1791_v12  ;;  %v1759_v22 = vmax.f32 %v1691_v15, 0.0 }
 0x326   : > { %v1697_v21 = vadd.f32 %v1696_v20, %v3921_v54  ;;  %v1760_v24 = vmax.f32 %v1693_v17, 0.0 }
 0x327   : > { %v1761_v23 = vmax.f32 %v1695_v19, 0.0 }
 0x328   : > { %v1762_v25 = vmax.f32 %v1697_v21, 0.0 }
 0x329   : > { %v1793_v26 = vpack.c.bf16 %v1761_v23, %v1759_v22 }
 0x32a   : > { %v1794_v27 = vpack.c.bf16 %v1762_v25, %v1760_v24 }
 0x32c   : > { %2082 = vmatprep.mubr.bf16.mxu1 %v1794_v27 }
 0x32d   : > { %2083 = vmatmul.mubr.bf16.gmra.mrb[112].mxu1 %v1793_v26 }
 0x388   : > { %v2803_v28 = vpop.f32.mrb[128].mxu0 }
 0x389   : > { %v2804_v30 = vpop.f32.mrb[129].mxu0 }
 0x38a   : > { %v2805_v42 = vadd.f32 %v2804_v30, %v2803_v28  ;;  %v2806_v31 = vpop.f32.mrb[130].mxu0 }
 0x38b   : > { %v2807_v32 = vpop.f32.mrb[131].mxu0 }
 0x38c   : > { %v1965_v54 = vadd.f32 %v2805_v42, %v3990_v29  ;;  %v2808_v33 = vadd.f32 %v2807_v32, %v2806_v31 }
 0x38e   : > { %v2091_v5 = vsub.f32 0.0, %v1965_v54  ;;  %v1968_v34 = vadd.f32 %v2808_v33, %v3990_v29 }
 0x390   : > { %v2123_v35 = vmul.f32 1.442695, %v2091_v5  ;;  %v2092_v37 = vsub.f32 0.0, %v1968_v34  ;;  %v2809_v39 = vpop.f32.mrb[132].mxu0 }
 0x391   : > { %v2810_v40 = vpop.f32.mrb[133].mxu0 }
 0x392   : > { %3129 = vpow2.f32 %v2123_v35  ;;  %v2125_v43 = vmul.f32 1.442695, %v2092_v37  ;;  %v2811_v44 = vadd.f32 %v2810_v40, %v2809_v39  ;;  %v2812_v45 = vpop.f32.mrb[134].mxu0 }
 0x393   : > { %v2813_v46 = vpop.f32.mrb[135].mxu0 }
 0x394   : > { %3131 = vpow2.f32 %v2125_v43  ;;  %v1973_v47 = vadd.f32 %v2811_v44, %v3990_v29  ;;  %v2814_v48 = vadd.f32 %v2813_v46, %v2812_v45 }
 0x396   : > { %v2093_v49 = vsub.f32 0.0, %v1973_v47  ;;  %v1976_v50 = vadd.f32 %v2814_v48, %v3990_v29 }
 0x398   : > { %v2127_v51 = vmul.f32 1.442695, %v2093_v49  ;;  %v2094_v52 = vsub.f32 0.0, %v1976_v50  ;;  %v2815_v53 = vpop.f32.mrb[136].mxu0 }
 0x399   : > { %v2816_v55 = vpop.f32.mrb[137].mxu0 }
 0x39a   : > { %3133 = vpow2.f32 %v2127_v51  ;;  %v2129_v56 = vmul.f32 1.442695, %v2094_v52  ;;  %v2817_v41 = vadd.f32 %v2816_v55, %v2815_v53  ;;  %v2818_v57 = vpop.f32.mrb[138].mxu0 }
 0x39b   : > { %v2819_v58 = vpop.f32.mrb[139].mxu0 }
 0x39c   : > { %v3130_v59 = vpop.eup %3129  ;;  %3135 = vpow2.f32 %v2129_v56  ;;  %v1981_v60 = vadd.f32 %v2817_v41, %v3990_v29  ;;  %v2820_v61 = vadd.f32 %v2819_v58, %v2818_v57 }
 0x39d   : > { %v2187_v62 = vadd.f32 1.0, %v3130_v59 }
 0x39e   : > { %v3132_v63 = vpop.eup %3131  ;;  %v2095_v0 = vsub.f32 0.0, %v1981_v60  ;;  %v1984_v1 = vadd.f32 %v2820_v61, %v3990_v29 }
 0x39f   : > { %3137 = vrcp.f32 %v2187_v62  ;;  %v2188_v36 = vadd.f32 1.0, %v3132_v63 }
 0x3a0   : > { %v2131_v2 = vmul.f32 1.442695, %v2095_v0  ;;  %v2096_v3 = vsub.f32 0.0, %v1984_v1  ;;  %v2821_v38 = vpop.f32.mrb[64].mxu1 }
 0x3a1   : > { %3139 = vrcp.f32 %v2188_v36  ;;  %v2822_v4 = vpop.f32.mrb[65].mxu1 }
 0x3a2   : > { %3141 = vpow2.f32 %v2131_v2  ;;  %v2133_v6 = vmul.f32 1.442695, %v2096_v3  ;;  %v2823_v7 = vadd.f32 %v2822_v4, %v2821_v38  ;;  %v2824_v8 = vpop.f32.mrb[66].mxu1 }
 0x3a3   : > { %v2825_v9 = vpop.f32.mrb[67].mxu1 }
 0x3a4   : > { %v3134_v10 = vpop.eup %3133  ;;  %3143 = vpow2.f32 %v2133_v6  ;;  %v1989_v11 = vadd.f32 %v2823_v7, %v3990_v29  ;;  %v2826_v12 = vadd.f32 %v2825_v9, %v2824_v8 }
 0x3a5   : > { %v2189_v13 = vadd.f32 1.0, %v3134_v10 }
 0x3a6   : > { %v3136_v14 = vpop.eup %3135  ;;  %v2097_v15 = vsub.f32 0.0, %v1989_v11  ;;  %v1992_v16 = vadd.f32 %v2826_v12, %v3990_v29 }
 0x3a7   : > { %3145 = vrcp.f32 %v2189_v13  ;;  %v2190_v17 = vadd.f32 1.0, %v3136_v14 }
 0x3a8   : > { %v2135_v18 = vmul.f32 1.442695, %v2097_v15  ;;  %v2098_v19 = vsub.f32 0.0, %v1992_v16  ;;  %v2827_v20 = vpop.f32.mrb[68].mxu1 }
 0x3a9   : > { %v3138_v21 = vpop.eup %3137  ;;  %3147 = vrcp.f32 %v2190_v17  ;;  %v2828_v22 = vpop.f32.mrb[69].mxu1 }
 0x3aa   : > { %2284 = vst.msk [vmem:[%s4001_s30] sm:$0xff] %vm2283_vm3, %v3138_v21  ;;  %3149 = vpow2.f32 %v2135_v18  ;;  %v2137_v23 = vmul.f32 1.442695, %v2098_v19  ;;  %v2829_v24 = vadd.f32 %v2828_v22, %v2827_v20  ;;  %v2830_v25 = vpop.f32.mrb[70].mxu1 }
 0x3ab   : > { %v3140_v26 = vpop.eup %3139  ;;  %v2831_v27 = vpop.f32.mrb[71].mxu1 }
 0x3ac   : > { %v3142_v28 = vpop.eup %3141  ;;  %2285 = vst.msk [vmem:[%s4001_s30 + $0x8] sm:$0xff] %vm2283_vm3, %v3140_v26  ;;  %3151 = vpow2.f32 %v2137_v23  ;;  %v1997_v30 = vadd.f32 %v2829_v24, %v3990_v29  ;;  %v2832_v42 = vadd.f32 %v2831_v27, %v2830_v25 }
 0x3ad   : > { %v2191_v31 = vadd.f32 1.0, %v3142_v28 }
 0x3ae   : > { %v3144_v32 = vpop.eup %3143  ;;  %v2099_v54 = vsub.f32 0.0, %v1997_v30  ;;  %v2000_v33 = vadd.f32 %v2832_v42, %v3990_v29 }
 0x3af   : > { %3153 = vrcp.f32 %v2191_v31  ;;  %v2192_v5 = vadd.f32 1.0, %v3144_v32 }
 0x3b0   : > { %v2139_v34 = vmul.f32 1.442695, %v2099_v54  ;;  %v2100_v35 = vsub.f32 0.0, %v2000_v33  ;;  %v2833_v37 = vpop.f32.mrb[72].mxu1 }
 0x3b1   : > { %v3146_v39 = vpop.eup %3145  ;;  %3155 = vrcp.f32 %v2192_v5  ;;  %v2834_v40 = vpop.f32.mrb[73].mxu1 }
 0x3b2   : > { %2286 = vst.msk [vmem:[%s4001_s30 + $0x10] sm:$0xff] %vm2283_vm3, %v3146_v39  ;;  %3157 = vpow2.f32 %v2139_v34  ;;  %v2141_v43 = vmul.f32 1.442695, %v2100_v35  ;;  %v2835_v44 = vadd.f32 %v2834_v40, %v2833_v37  ;;  %v2836_v45 = vpop.f32.mrb[74].mxu1 }
 0x3b3   : > { %v3148_v46 = vpop.eup %3147  ;;  %v2837_v47 = vpop.f32.mrb[75].mxu1 }
 0x3b4   : > { %v3150_v48 = vpop.eup %3149  ;;  %2287 = vst.msk [vmem:[%s4001_s30 + $0x18] sm:$0xff] %vm2283_vm3, %v3148_v46  ;;  %3159 = vpow2.f32 %v2141_v43  ;;  %v2005_v49 = vadd.f32 %v2835_v44, %v3990_v29  ;;  %v2838_v50 = vadd.f32 %v2837_v47, %v2836_v45 }
 0x3b5   : > { %v2193_v51 = vadd.f32 1.0, %v3150_v48 }
 0x3b6   : > { %v3152_v52 = vpop.eup %3151  ;;  %v2101_v53 = vsub.f32 0.0, %v2005_v49  ;;  %v2008_v55 = vadd.f32 %v2838_v50, %v3990_v29 }
 0x3b7   : > { %3161 = vrcp.f32 %v2193_v51  ;;  %v2194_v56 = vadd.f32 1.0, %v3152_v52 }
 0x3b8   : > { %v2143_v41 = vmul.f32 1.442695, %v2101_v53  ;;  %v2102_v57 = vsub.f32 0.0, %v2008_v55  ;;  %v2839_v58 = vpop.f32.mrb[76].mxu1 }
 0x3b9   : > { %v3154_v59 = vpop.eup %3153  ;;  %3163 = vrcp.f32 %v2194_v56  ;;  %v2840_v60 = vpop.f32.mrb[77].mxu1 }
 0x3ba   : > { %2288 = vst.msk [vmem:[%s4001_s30 + $0x20] sm:$0xff] %vm2283_vm3, %v3154_v59  ;;  %3165 = vpow2.f32 %v2143_v41  ;;  %v2145_v61 = vmul.f32 1.442695, %v2102_v57  ;;  %v2841_v62 = vadd.f32 %v2840_v60, %v2839_v58  ;;  %v2842_v63 = vpop.f32.mrb[78].mxu1 }
 0x3bb   : > { %v3156_v0 = vpop.eup %3155  ;;  %v2843_v1 = vpop.f32.mrb[79].mxu1 }
 0x3bc   : > { %v3158_v36 = vpop.eup %3157  ;;  %2289 = vst.msk [vmem:[%s4001_s30 + $0x28] sm:$0xff] %vm2283_vm3, %v3156_v0  ;;  %3167 = vpow2.f32 %v2145_v61  ;;  %v2013_v2 = vadd.f32 %v2841_v62, %v3990_v29  ;;  %v2844_v3 = vadd.f32 %v2843_v1, %v2842_v63 }
 0x3bd   : > { %v2195_v38 = vadd.f32 1.0, %v3158_v36 }
 0x3be   : > { %v3160_v4 = vpop.eup %3159  ;;  %v2103_v6 = vsub.f32 0.0, %v2013_v2  ;;  %v2016_v7 = vadd.f32 %v2844_v3, %v3990_v29 }
 0x3bf   : > { %3169 = vrcp.f32 %v2195_v38  ;;  %v2196_v8 = vadd.f32 1.0, %v3160_v4 }
 0x3c0   : > { %v2147_v9 = vmul.f32 1.442695, %v2103_v6  ;;  %v2104_v10 = vsub.f32 0.0, %v2016_v7  ;;  %v2845_v11 = vpop.f32.mrb[80].mxu1 }
 0x3c1   : > { %v3162_v12 = vpop.eup %3161  ;;  %3171 = vrcp.f32 %v2196_v8  ;;  %v2846_v13 = vpop.f32.mrb[81].mxu1 }
 0x3c2   : > { %2290 = vst.msk [vmem:[%s4001_s30 + $0x30] sm:$0xff] %vm2283_vm3, %v3162_v12  ;;  %3173 = vpow2.f32 %v2147_v9  ;;  %v2149_v14 = vmul.f32 1.442695, %v2104_v10  ;;  %v2847_v15 = vadd.f32 %v2846_v13, %v2845_v11  ;;  %v2848_v16 = vpop.f32.mrb[82].mxu1 }
 0x3c3   : > { %v3164_v17 = vpop.eup %3163  ;;  %v2849_v18 = vpop.f32.mrb[83].mxu1 }
 0x3c4   : > { %v3166_v19 = vpop.eup %3165  ;;  %2291 = vst.msk [vmem:[%s4001_s30 + $0x38] sm:$0xff] %vm2283_vm3, %v3164_v17  ;;  %3175 = vpow2.f32 %v2149_v14  ;;  %v2021_v20 = vadd.f32 %v2847_v15, %v3990_v29  ;;  %v2850_v21 = vadd.f32 %v2849_v18, %v2848_v16 }
 0x3c5   : > { %v2197_v22 = vadd.f32 1.0, %v3166_v19 }
 0x3c6   : > { %v3168_v23 = vpop.eup %3167  ;;  %v2105_v24 = vsub.f32 0.0, %v2021_v20  ;;  %v2024_v25 = vadd.f32 %v2850_v21, %v3990_v29 }
 0x3c7   : > { %3177 = vrcp.f32 %v2197_v22  ;;  %v2198_v26 = vadd.f32 1.0, %v3168_v23 }
 0x3c8   : > { %v2151_v27 = vmul.f32 1.442695, %v2105_v24  ;;  %v2106_v28 = vsub.f32 0.0, %v2024_v25  ;;  %v2851_v30 = vpop.f32.mrb[84].mxu1 }
 0x3c9   : > { %v3170_v42 = vpop.eup %3169  ;;  %3179 = vrcp.f32 %v2198_v26  ;;  %v2852_v31 = vpop.f32.mrb[85].mxu1 }
 0x3ca   : > { %2292 = vst.msk [vmem:[%s4001_s30 + $0x40] sm:$0xff] %vm2283_vm3, %v3170_v42  ;;  %3181 = vpow2.f32 %v2151_v27  ;;  %v2153_v32 = vmul.f32 1.442695, %v2106_v28  ;;  %v2853_v54 = vadd.f32 %v2852_v31, %v2851_v30  ;;  %v2854_v33 = vpop.f32.mrb[86].mxu1 }
 0x3cb   : > { %v3172_v5 = vpop.eup %3171  ;;  %v2855_v34 = vpop.f32.mrb[87].mxu1 }
 0x3cc   : > { %v3174_v35 = vpop.eup %3173  ;;  %2293 = vst.msk [vmem:[%s4001_s30 + $0x48] sm:$0xff] %vm2283_vm3, %v3172_v5  ;;  %3183 = vpow2.f32 %v2153_v32  ;;  %v2029_v37 = vadd.f32 %v2853_v54, %v3990_v29  ;;  %v2856_v39 = vadd.f32 %v2855_v34, %v2854_v33 }
 0x3cd   : > { %v2199_v40 = vadd.f32 1.0, %v3174_v35 }
 0x3ce   : > { %v3176_v43 = vpop.eup %3175  ;;  %v2107_v44 = vsub.f32 0.0, %v2029_v37  ;;  %v2032_v45 = vadd.f32 %v2856_v39, %v3990_v29 }
 0x3cf   : > { %3185 = vrcp.f32 %v2199_v40  ;;  %v2200_v46 = vadd.f32 1.0, %v3176_v43 }
 0x3d0   : > { %v2155_v47 = vmul.f32 1.442695, %v2107_v44  ;;  %v2108_v48 = vsub.f32 0.0, %v2032_v45  ;;  %v2857_v49 = vpop.f32.mrb[88].mxu1 }
 0x3d1   : > { %v3178_v50 = vpop.eup %3177  ;;  %3187 = vrcp.f32 %v2200_v46  ;;  %v2858_v51 = vpop.f32.mrb[89].mxu1 }
 0x3d2   : > { %2294 = vst.msk [vmem:[%s4001_s30 + $0x50] sm:$0xff] %vm2283_vm3, %v3178_v50  ;;  %3189 = vpow2.f32 %v2155_v47  ;;  %v2157_v52 = vmul.f32 1.442695, %v2108_v48  ;;  %v2859_v53 = vadd.f32 %v2858_v51, %v2857_v49  ;;  %v2860_v55 = vpop.f32.mrb[90].mxu1 }
 0x3d3   : > { %v3180_v56 = vpop.eup %3179  ;;  %v2861_v41 = vpop.f32.mrb[91].mxu1 }
 0x3d4   : > { %v3182_v57 = vpop.eup %3181  ;;  %2295 = vst.msk [vmem:[%s4001_s30 + $0x58] sm:$0xff] %vm2283_vm3, %v3180_v56  ;;  %3191 = vpow2.f32 %v2157_v52  ;;  %v2037_v58 = vadd.f32 %v2859_v53, %v3990_v29  ;;  %v2862_v59 = vadd.f32 %v2861_v41, %v2860_v55 }
 0x3d5   : > { %v2201_v60 = vadd.f32 1.0, %v3182_v57 }
 0x3d6   : > { %v3184_v61 = vpop.eup %3183  ;;  %v2109_v62 = vsub.f32 0.0, %v2037_v58  ;;  %v2040_v63 = vadd.f32 %v2862_v59, %v3990_v29 }
 0x3d7   : > { %3193 = vrcp.f32 %v2201_v60  ;;  %v2202_v0 = vadd.f32 1.0, %v3184_v61 }
 0x3d8   : > { %v2159_v1 = vmul.f32 1.442695, %v2109_v62  ;;  %v2110_v36 = vsub.f32 0.0, %v2040_v63  ;;  %v2863_v2 = vpop.f32.mrb[92].mxu1 }
 0x3d9   : > { %v3186_v3 = vpop.eup %3185  ;;  %3195 = vrcp.f32 %v2202_v0  ;;  %v2864_v38 = vpop.f32.mrb[93].mxu1 }
 0x3da   : > { %2296 = vst.msk [vmem:[%s4001_s30 + $0x60] sm:$0xff] %vm2283_vm3, %v3186_v3  ;;  %3197 = vpow2.f32 %v2159_v1  ;;  %v2161_v4 = vmul.f32 1.442695, %v2110_v36  ;;  %v2865_v6 = vadd.f32 %v2864_v38, %v2863_v2  ;;  %v2866_v7 = vpop.f32.mrb[94].mxu1 }
 0x3db   : > { %v3188_v8 = vpop.eup %3187  ;;  %v2867_v9 = vpop.f32.mrb[95].mxu1 }
 0x3dc   : > { %v3190_v10 = vpop.eup %3189  ;;  %2297 = vst.msk [vmem:[%s4001_s30 + $0x68] sm:$0xff] %vm2283_vm3, %v3188_v8  ;;  %3199 = vpow2.f32 %v2161_v4  ;;  %v2045_v11 = vadd.f32 %v2865_v6, %v3990_v29  ;;  %v2868_v12 = vadd.f32 %v2867_v9, %v2866_v7 }
 0x3dd   : > { %v2203_v13 = vadd.f32 1.0, %v3190_v10 }
 0x3de   : > { %v3192_v14 = vpop.eup %3191  ;;  %v2111_v15 = vsub.f32 0.0, %v2045_v11  ;;  %v2048_v16 = vadd.f32 %v2868_v12, %v3990_v29 }
 0x3df   : > { %3201 = vrcp.f32 %v2203_v13  ;;  %v2204_v17 = vadd.f32 1.0, %v3192_v14 }
 0x3e0   : > { %v2163_v18 = vmul.f32 1.442695, %v2111_v15  ;;  %v2112_v19 = vsub.f32 0.0, %v2048_v16  ;;  %v2869_v20 = vpop.f32.mrb[96].mxu1 }
 0x3e1   : > { %v3194_v21 = vpop.eup %3193  ;;  %3203 = vrcp.f32 %v2204_v17  ;;  %v2870_v22 = vpop.f32.mrb[97].mxu1 }
 0x3e2   : > { %2298 = vst.msk [vmem:[%s4001_s30 + $0x70] sm:$0xff] %vm2283_vm3, %v3194_v21  ;;  %3205 = vpow2.f32 %v2163_v18  ;;  %v2165_v23 = vmul.f32 1.442695, %v2112_v19  ;;  %v2871_v24 = vadd.f32 %v2870_v22, %v2869_v20  ;;  %v2872_v25 = vpop.f32.mrb[98].mxu1 }
 0x3e3   : > { %v3196_v26 = vpop.eup %3195  ;;  %v2873_v27 = vpop.f32.mrb[99].mxu1 }
 0x3e4   : > { %v3198_v28 = vpop.eup %3197  ;;  %2299 = vst.msk [vmem:[%s4001_s30 + $0x78] sm:$0xff] %vm2283_vm3, %v3196_v26  ;;  %3207 = vpow2.f32 %v2165_v23  ;;  %v2053_v30 = vadd.f32 %v2871_v24, %v3990_v29  ;;  %v2874_v42 = vadd.f32 %v2873_v27, %v2872_v25 }
 0x3e5   : > { %v2205_v31 = vadd.f32 1.0, %v3198_v28 }
 0x3e6   : > { %v3200_v32 = vpop.eup %3199  ;;  %v2113_v54 = vsub.f32 0.0, %v2053_v30  ;;  %v2056_v33 = vadd.f32 %v2874_v42, %v3990_v29 }
 0x3e7   : > { %3209 = vrcp.f32 %v2205_v31  ;;  %v2206_v5 = vadd.f32 1.0, %v3200_v32 }
 0x3e8   : > { %v2167_v34 = vmul.f32 1.442695, %v2113_v54  ;;  %v2114_v35 = vsub.f32 0.0, %v2056_v33  ;;  %v2875_v37 = vpop.f32.mrb[100].mxu1 }
 0x3e9   : > { %v3202_v39 = vpop.eup %3201  ;;  %3211 = vrcp.f32 %v2206_v5  ;;  %v2876_v40 = vpop.f32.mrb[101].mxu1 }
 0x3ea   : > { %2300 = vst.msk [vmem:[%s4001_s30 + $0x80] sm:$0xff] %vm2283_vm3, %v3202_v39  ;;  %3213 = vpow2.f32 %v2167_v34  ;;  %v2169_v43 = vmul.f32 1.442695, %v2114_v35  ;;  %v2877_v44 = vadd.f32 %v2876_v40, %v2875_v37  ;;  %v2878_v45 = vpop.f32.mrb[102].mxu1 }
 0x3eb   : > { %v3204_v46 = vpop.eup %3203  ;;  %v2879_v47 = vpop.f32.mrb[103].mxu1 }
 0x3ec   : > { %v3206_v48 = vpop.eup %3205  ;;  %2301 = vst.msk [vmem:[%s4001_s30 + $0x88] sm:$0xff] %vm2283_vm3, %v3204_v46  ;;  %3215 = vpow2.f32 %v2169_v43  ;;  %v2061_v49 = vadd.f32 %v2877_v44, %v3990_v29  ;;  %v2880_v50 = vadd.f32 %v2879_v47, %v2878_v45 }
 0x3ed   : > { %v2207_v51 = vadd.f32 1.0, %v3206_v48 }
 0x3ee   : > { %v3208_v52 = vpop.eup %3207  ;;  %v2115_v53 = vsub.f32 0.0, %v2061_v49  ;;  %v2064_v55 = vadd.f32 %v2880_v50, %v3990_v29 }
 0x3ef   : > { %3217 = vrcp.f32 %v2207_v51  ;;  %v2208_v56 = vadd.f32 1.0, %v3208_v52 }
 0x3f0   : > { %v2171_v41 = vmul.f32 1.442695, %v2115_v53  ;;  %v2116_v57 = vsub.f32 0.0, %v2064_v55  ;;  %v2881_v58 = vpop.f32.mrb[104].mxu1 }
 0x3f1   : > { %v3210_v59 = vpop.eup %3209  ;;  %3219 = vrcp.f32 %v2208_v56  ;;  %v2882_v60 = vpop.f32.mrb[105].mxu1 }
 0x3f2   : > { %2302 = vst.msk [vmem:[%s4001_s30 + $0x90] sm:$0xff] %vm2283_vm3, %v3210_v59  ;;  %3221 = vpow2.f32 %v2171_v41  ;;  %v2173_v61 = vmul.f32 1.442695, %v2116_v57  ;;  %v2883_v62 = vadd.f32 %v2882_v60, %v2881_v58  ;;  %v2884_v63 = vpop.f32.mrb[106].mxu1 }
 0x3f3   : > { %v3212_v0 = vpop.eup %3211  ;;  %v2885_v1 = vpop.f32.mrb[107].mxu1 }
 0x3f4   : > { %v3214_v36 = vpop.eup %3213  ;;  %2303 = vst.msk [vmem:[%s4001_s30 + $0x98] sm:$0xff] %vm2283_vm3, %v3212_v0  ;;  %3223 = vpow2.f32 %v2173_v61  ;;  %v2069_v2 = vadd.f32 %v2883_v62, %v3990_v29  ;;  %v2886_v3 = vadd.f32 %v2885_v1, %v2884_v63 }
 0x3f5   : > { %v2209_v38 = vadd.f32 1.0, %v3214_v36 }
 0x3f6   : > { %v3216_v4 = vpop.eup %3215  ;;  %v2117_v6 = vsub.f32 0.0, %v2069_v2  ;;  %v2072_v7 = vadd.f32 %v2886_v3, %v3990_v29 }
 0x3f7   : > { %3225 = vrcp.f32 %v2209_v38  ;;  %v2210_v8 = vadd.f32 1.0, %v3216_v4 }
 0x3f8   : > { %v2175_v9 = vmul.f32 1.442695, %v2117_v6  ;;  %v2118_v10 = vsub.f32 0.0, %v2072_v7  ;;  %v2887_v11 = vpop.f32.mrb[108].mxu1 }
 0x3f9   : > { %v3218_v12 = vpop.eup %3217  ;;  %3227 = vrcp.f32 %v2210_v8  ;;  %v2888_v13 = vpop.f32.mrb[109].mxu1 }
 0x3fa   : > { %2304 = vst.msk [vmem:[%s4001_s30 + $0xa0] sm:$0xff] %vm2283_vm3, %v3218_v12  ;;  %3229 = vpow2.f32 %v2175_v9  ;;  %v2177_v14 = vmul.f32 1.442695, %v2118_v10  ;;  %v2889_v15 = vadd.f32 %v2888_v13, %v2887_v11  ;;  %v2890_v16 = vpop.f32.mrb[110].mxu1 }
 0x3fb   : > { %v3220_v17 = vpop.eup %3219  ;;  %v2891_v18 = vpop.f32.mrb[111].mxu1 }
 0x3fc   : > { %v3222_v19 = vpop.eup %3221  ;;  %2305 = vst.msk [vmem:[%s4001_s30 + $0xa8] sm:$0xff] %vm2283_vm3, %v3220_v17  ;;  %3231 = vpow2.f32 %v2177_v14  ;;  %v2077_v20 = vadd.f32 %v2889_v15, %v3990_v29  ;;  %v2892_v21 = vadd.f32 %v2891_v18, %v2890_v16 }
 0x3fd   : > { %v2211_v22 = vadd.f32 1.0, %v3222_v19 }
 0x3fe   : > { %v3224_v23 = vpop.eup %3223  ;;  %v2119_v24 = vsub.f32 0.0, %v2077_v20  ;;  %v2080_v25 = vadd.f32 %v2892_v21, %v3990_v29 }
 0x3ff   : > { %3233 = vrcp.f32 %v2211_v22  ;;  %v2212_v26 = vadd.f32 1.0, %v3224_v23 }
 0x400   : > { %v2179_v27 = vmul.f32 1.442695, %v2119_v24  ;;  %v2120_v28 = vsub.f32 0.0, %v2080_v25  ;;  %v2893_v30 = vpop.f32.mrb[112].mxu1 }
 0x401   : > { %v3226_v42 = vpop.eup %3225  ;;  %3235 = vrcp.f32 %v2212_v26  ;;  %v2894_v31 = vpop.f32.mrb[113].mxu1 }
 0x402   : > { %2306 = vst.msk [vmem:[%s4001_s30 + $0xb0] sm:$0xff] %vm2283_vm3, %v3226_v42  ;;  %3237 = vpow2.f32 %v2179_v27  ;;  %v2181_v32 = vmul.f32 1.442695, %v2120_v28  ;;  %v2895_v54 = vadd.f32 %v2894_v31, %v2893_v30  ;;  %v2896_v33 = vpop.f32.mrb[114].mxu1 }
 0x403   : > { %v3228_v5 = vpop.eup %3227  ;;  %v2897_v34 = vpop.f32.mrb[115].mxu1 }
 0x404   : > { %v3230_v35 = vpop.eup %3229  ;;  %2307 = vst.msk [vmem:[%s4001_s30 + $0xb8] sm:$0xff] %vm2283_vm3, %v3228_v5  ;;  %3239 = vpow2.f32 %v2181_v32  ;;  %v2085_v37 = vadd.f32 %v2895_v54, %v3990_v29  ;;  %v2898_v39 = vadd.f32 %v2897_v34, %v2896_v33 }
 0x405   : > { %v2213_v40 = vadd.f32 1.0, %v3230_v35 }
 0x406   : > { %v3232_v43 = vpop.eup %3231  ;;  %v2121_v44 = vsub.f32 0.0, %v2085_v37  ;;  %v2088_v45 = vadd.f32 %v2898_v39, %v3990_v29 }
 0x407   : > { %3241 = vrcp.f32 %v2213_v40  ;;  %v2214_v46 = vadd.f32 1.0, %v3232_v43 }
 0x408   : > { %v2183_v47 = vmul.f32 1.442695, %v2121_v44  ;;  %v2122_v48 = vsub.f32 0.0, %v2088_v45 }
 0x409   : > { %v3234_v49 = vpop.eup %3233  ;;  %3243 = vrcp.f32 %v2214_v46 }
 0x40a   : > { %2308 = vst.msk [vmem:[%s4001_s30 + $0xc0] sm:$0xff] %vm2283_vm3, %v3234_v49  ;;  %3245 = vpow2.f32 %v2183_v47  ;;  %v2185_v50 = vmul.f32 1.442695, %v2122_v48 }
 0x40b   : > { %v3236_v51 = vpop.eup %3235 }
 0x40c   : > { %v3238_v52 = vpop.eup %3237  ;;  %2309 = vst.msk [vmem:[%s4001_s30 + $0xc8] sm:$0xff] %vm2283_vm3, %v3236_v51  ;;  %3247 = vpow2.f32 %v2185_v50 }
 0x40d   : > { %v2215_v53 = vadd.f32 1.0, %v3238_v52 }
 0x40e   : > { %v3240_v29 = vpop.eup %3239 }
 0x40f   : > { %3249 = vrcp.f32 %v2215_v53  ;;  %v2216_v55 = vadd.f32 1.0, %v3240_v29 }
 0x411   : > { %v3242_v56 = vpop.eup %3241  ;;  %3251 = vrcp.f32 %v2216_v55 }
 0x412   : > { %2310 = vst.msk [vmem:[%s4001_s30 + $0xd0] sm:$0xff] %vm2283_vm3, %v3242_v56 }
 0x413   : > { %v3244_v41 = vpop.eup %3243 }
 0x414   : > { %v3246_v57 = vpop.eup %3245  ;;  %2311 = vst.msk [vmem:[%s4001_s30 + $0xd8] sm:$0xff] %vm2283_vm3, %v3244_v41 }
 0x415   : > { %v2217_v58 = vadd.f32 1.0, %v3246_v57 }
 0x416   : > { %v3248_v59 = vpop.eup %3247 }
 0x417   : > { %3253 = vrcp.f32 %v2217_v58  ;;  %v2218_v60 = vadd.f32 1.0, %v3248_v59 }
 0x419   : > { %v3250_v61 = vpop.eup %3249  ;;  %3255 = vrcp.f32 %v2218_v60 }
 0x41a   : > { %2312 = vst.msk [vmem:[%s4001_s30 + $0xe0] sm:$0xff] %vm2283_vm3, %v3250_v61 }
 0x41b   : > { %v3252_v62 = vpop.eup %3251 }
 0x41c   : > { %2313 = vst.msk [vmem:[%s4001_s30 + $0xe8] sm:$0xff] %vm2283_vm3, %v3252_v62 }
 0x41e   : > { %2322 = sbr.rel (!%p3422_p4) target bundleno = 1117 (0x45d), region = 60 }
 0x421   : > { %v3254_v63 = vpop.eup %3253 }
 0x422   : > { %2314 = vst.msk [vmem:[%s4001_s30 + $0xf0] sm:$0xff] %vm2283_vm3, %v3254_v63 }
 0x423   : > { %v3256_v0 = vpop.eup %3255 }
 0x424   : > { %2315 = vst.msk [vmem:[%s4001_s30 + $0xf8] sm:$0xff] %vm2283_vm3, %v3256_v0 }
 0x425   : > { %s4250_s15 = smov (!%p2325_p8, %s2324_s15), 32 }
 0x426   : > { %s2769_s22 = sshll.u32 %s4250_s15, 7 }
 0x427   : > { %p2772_p9 = scmp.eq.s32.totalorder %s2769_s22, 0 }
 0x428   : > { %s4104_s23 = sshrl.u32 (!%p2772_p9), %s4250_s15, 5 }
 0x429   : > { %2333 = sbr.rel (%p2772_p9) target bundleno = 1117 (0x45d), region = 64  ;;  %p2773_p10 = scmp.le.s32.totalorder (!%p2772_p9), %s4104_s23, 0 }
 0x430   : > { %2611 = sbr.rel (%p2773_p10) target bundleno = 1096 (0x448), region = 140  ;;  %s4241_s12 = smov (!%p2773_p10), %s4098_s21 }
 0x431   : > { %s4242_s17 = smov (!%p2773_p10), %s4001_s30  ;;  %s4113_s11 = smov (!%p2773_p10), 0  }
 0x432   : > { %s4115_s25 = smov (!%p2773_p10), 0  }
 0x437 LB: >> { %v2457_v1 = vld [vmem:[%s3319_s17] sm:$0xff]  ;;  %v2459_v36 = vld [vmem:[%s3319_s17 + $0x8] sm:$0xff]  ;;  %v2461_v2 = vld [vmem:[%s3319_s17 + $0x10] sm:$0xff]  ;;  %s2521_s26 = sadd.s32 1, %s3323_s11  ;;  %s2451_s25 = sadd.s32 1, %s3327_s25   ;;  %s3327_s25 = sphi %s4115_s25, %s2451_s25   ;;  %s3323_s11 = sphi %s4113_s11, %s4245_s11   ;;  %s3319_s17 = sphi %s4242_s17, %s4244_s17   ;;  %s3315_s12 = sphi %s4241_s12, %s4243_s12  }
 0x438   : >> { %2458 = vst [vmem:[%s3315_s12] sm:$0xff] %v2457_v1  ;;  %2460 = vst [vmem:[%s3315_s12 + $0x8] sm:$0xff] %v2459_v36  ;;  %v2463_v3 = vld [vmem:[%s3319_s17 + $0x18] sm:$0xff]  ;;  %v2465_v38 = vld [vmem:[%s3319_s17 + $0x20] sm:$0xff]  ;;  %p2522_p11 = scmp.ge.s32.totalorder %s2521_s26, %s4104_s23  ;;  %p2450_p12 = scmp.ge.s32.totalorder %s2451_s25, %s4104_s23 }
 0x439   : >> { %2462 = vst [vmem:[%s3315_s12 + $0x10] sm:$0xff] %v2461_v2  ;;  %v2467_v4 = vld [vmem:[%s3319_s17 + $0x28] sm:$0xff]  ;;  %2464 = vst [vmem:[%s3315_s12 + $0x18] sm:$0xff] %v2463_v3  ;;  %v2469_v6 = vld [vmem:[%s3319_s17 + $0x30] sm:$0xff] }
 0x43a   : >> { %2466 = vst [vmem:[%s3315_s12 + $0x20] sm:$0xff] %v2465_v38  ;;  %2468 = vst [vmem:[%s3315_s12 + $0x28] sm:$0xff] %v2467_v4  ;;  %v2471_v7 = vld [vmem:[%s3319_s17 + $0x38] sm:$0xff]  ;;  %v2473_v8 = vld [vmem:[%s3319_s17 + $0x40] sm:$0xff]  ;;  %s4252_s26 = smov (%p2522_p11, %s2521_s26), 0 }
 0x43b   : >> { %2470 = vst [vmem:[%s3315_s12 + $0x30] sm:$0xff] %v2469_v6  ;;  %2472 = vst [vmem:[%s3315_s12 + $0x38] sm:$0xff] %v2471_v7  ;;  %v2475_v9 = vld [vmem:[%s3319_s17 + $0x48] sm:$0xff]  ;;  %v2477_v10 = vld [vmem:[%s3319_s17 + $0x50] sm:$0xff]  ;;  %s2774_s27 = sshll.u32 %s4252_s26, 8  ;;  %s4245_s11 = smov %s4252_s26 }
 0x43c   : >> { %2474 = vst [vmem:[%s3315_s12 + $0x40] sm:$0xff] %v2473_v8  ;;  %v2479_v11 = vld [vmem:[%s3319_s17 + $0x58] sm:$0xff]  ;;  %2476 = vst [vmem:[%s3315_s12 + $0x48] sm:$0xff] %v2475_v9  ;;  %v2481_v12 = vld [vmem:[%s3319_s17 + $0x60] sm:$0xff]  ;;  %s4171_s28 = scalar_lea.vmem %s4001_s30, %s2774_s27 [#allocation2]   ;;  %s2527_s29 = scalar_lea.vmem %s4098_s21, %s2774_s27  }
 0x43d   : >> { %2478 = vst [vmem:[%s3315_s12 + $0x50] sm:$0xff] %v2477_v10  ;;  %2480 = vst [vmem:[%s3315_s12 + $0x58] sm:$0xff] %v2479_v11  ;;  %v2483_v13 = vld [vmem:[%s3319_s17 + $0x68] sm:$0xff]  ;;  %v2485_v14 = vld [vmem:[%s3319_s17 + $0x70] sm:$0xff] }
 0x43e   : >> { %2482 = vst [vmem:[%s3315_s12 + $0x60] sm:$0xff] %v2481_v12  ;;  %2484 = vst [vmem:[%s3315_s12 + $0x68] sm:$0xff] %v2483_v13  ;;  %v2487_v15 = vld [vmem:[%s3319_s17 + $0x78] sm:$0xff]  ;;  %v2489_v16 = vld [vmem:[%s3319_s17 + $0x80] sm:$0xff] }
 0x43f   : >> { %2486 = vst [vmem:[%s3315_s12 + $0x70] sm:$0xff] %v2485_v14  ;;  %v2491_v17 = vld [vmem:[%s3319_s17 + $0x88] sm:$0xff]  ;;  %2488 = vst [vmem:[%s3315_s12 + $0x78] sm:$0xff] %v2487_v15  ;;  %v2493_v18 = vld [vmem:[%s3319_s17 + $0x90] sm:$0xff] }
 0x440   : >> { %2490 = vst [vmem:[%s3315_s12 + $0x80] sm:$0xff] %v2489_v16  ;;  %2492 = vst [vmem:[%s3315_s12 + $0x88] sm:$0xff] %v2491_v17  ;;  %v2495_v19 = vld [vmem:[%s3319_s17 + $0x98] sm:$0xff]  ;;  %v2497_v20 = vld [vmem:[%s3319_s17 + $0xa0] sm:$0xff] }
 0x441   : >> { %2494 = vst [vmem:[%s3315_s12 + $0x90] sm:$0xff] %v2493_v18  ;;  %2496 = vst [vmem:[%s3315_s12 + $0x98] sm:$0xff] %v2495_v19  ;;  %v2499_v21 = vld [vmem:[%s3319_s17 + $0xa8] sm:$0xff]  ;;  %v2501_v22 = vld [vmem:[%s3319_s17 + $0xb0] sm:$0xff]  ;;  %2453 = sbr.rel (!%p2450_p12) target bundleno = 1079 (0x437), region = 146 }
 0x442   : >> { %2498 = vst [vmem:[%s3315_s12 + $0xa0] sm:$0xff] %v2497_v20  ;;  %v2503_v23 = vld [vmem:[%s3319_s17 + $0xb8] sm:$0xff]  ;;  %2500 = vst [vmem:[%s3315_s12 + $0xa8] sm:$0xff] %v2499_v21  ;;  %v2505_v24 = vld [vmem:[%s3319_s17 + $0xc0] sm:$0xff] }
 0x443   : >> { %2502 = vst [vmem:[%s3315_s12 + $0xb0] sm:$0xff] %v2501_v22  ;;  %2504 = vst [vmem:[%s3315_s12 + $0xb8] sm:$0xff] %v2503_v23  ;;  %v2507_v25 = vld [vmem:[%s3319_s17 + $0xc8] sm:$0xff]  ;;  %v2509_v26 = vld [vmem:[%s3319_s17 + $0xd0] sm:$0xff] }
 0x444   : >> { %2506 = vst [vmem:[%s3315_s12 + $0xc0] sm:$0xff] %v2505_v24  ;;  %2508 = vst [vmem:[%s3315_s12 + $0xc8] sm:$0xff] %v2507_v25  ;;  %v2511_v27 = vld [vmem:[%s3319_s17 + $0xd8] sm:$0xff]  ;;  %v2513_v28 = vld [vmem:[%s3319_s17 + $0xe0] sm:$0xff] }
 0x445   : >> { %2510 = vst [vmem:[%s3315_s12 + $0xd0] sm:$0xff] %v2509_v26  ;;  %v2515_v30 = vld [vmem:[%s3319_s17 + $0xe8] sm:$0xff]  ;;  %2512 = vst [vmem:[%s3315_s12 + $0xd8] sm:$0xff] %v2511_v27  ;;  %v2517_v42 = vld [vmem:[%s3319_s17 + $0xf0] sm:$0xff] }
 0x446   : >> { %2514 = vst [vmem:[%s3315_s12 + $0xe0] sm:$0xff] %v2513_v28  ;;  %2516 = vst [vmem:[%s3315_s12 + $0xe8] sm:$0xff] %v2515_v30  ;;  %v2519_v31 = vld [vmem:[%s3319_s17 + $0xf8] sm:$0xff]  ;;  %s4244_s17 = smov %s4171_s28 }
 0x447   : >> { %2518 = vst [vmem:[%s3315_s12 + $0xf0] sm:$0xff] %v2517_v42  ;;  %2520 = vst [vmem:[%s3315_s12 + $0xf8] sm:$0xff] %v2519_v31  ;;  %s4243_s12 = smov %s2527_s29 }
 0x448 PF: > { %s4212_s14 = sand.u32 31, %s4250_s15   ;;  %s2785_s24 = sshll.u32 %s4104_s23, 8 }
 0x449   : > { %s2532_s18 = scalar_lea.vmem %s4001_s30, %s2785_s24 [#allocation2]   ;;  %s2534_s19 = scalar_lea.vmem %s4098_s21, %s2785_s24  }
 0x44a   : > { %p2779_p13 = scmp.le.s32.totalorder %s4212_s14, 0 }
 0x44b   : > { %s3329_s20 = smov (!%p2779_p13), %s2534_s19   ;;  %s3333_s22 = smov (!%p2779_p13), %s2532_s18  }
 0x44c   : > { %2625 = sbr.rel (%p2779_p13) target bundleno = 1117 (0x45d), region = 151  ;;  %s3337_s27 = smov (!%p2779_p13), 0  }
 0x44d   : > { %s3341_s26 = smov (!%p2779_p13), 0  }
 0x453 LB: >> { %v2544_v32 = vld [vmem:[%s3335_s22] sm:$0xff]  ;;  %s2546_s15 = sadd.s32 1, %s3339_s27  ;;  %s2538_s26 = sadd.s32 1, %s3343_s26   ;;  %s3343_s26 = sphi %s3341_s26, %s2538_s26   ;;  %s3339_s27 = sphi %s3337_s27, %s3338_s27   ;;  %s3335_s22 = sphi %s3333_s22, %s2551_s22   ;;  %s3331_s20 = sphi %s3329_s20, %s2552_s20  }
 0x454   : >> { %2545 = vst [vmem:[%s3331_s20] sm:$0xff] %v2544_v32  ;;  %p2547_p0 = scmp.ge.s32.totalorder %s2546_s15, %s4212_s14  ;;  %p2537_p1 = scmp.ge.s32.totalorder %s2538_s26, %s4212_s14 }
 0x456   : >> { %s4254_s15 = smov (%p2547_p0, %s2546_s15), 0  ;;  %2540 = sbr.rel (!%p2537_p1) target bundleno = 1107 (0x453), region = 157 }
 0x457   : >> { %s2780_s30 = sshll.u32 %s4254_s15, 3  ;;  %s3338_s27 = smov %s4254_s15  }
 0x458   : >> { %s2551_s22 = scalar_lea.vmem %s2532_s18, %s2780_s30 [#allocation2]   ;;  %s2552_s20 = scalar_lea.vmem %s2534_s19, %s2780_s30  }
 0x45d PF: > { %p16_p2 = scmp.ge.s32.totalorder %s3412_s13, 4   ;;  %s4246_s30 = smov %s3307_s10 }
 0x45e   : > { %s4247_s10 = smov %s3420_s16  ;;  %s4248_s11 = smov %s3412_s13 }
 0x45f   :  { %18 = sbr.rel (!%p16_p2) target bundleno = 2 (0x2), region = 168 }

</bundles_post_ra>
